<compile_context>
chip_gen: v7x
topology: tpu7x:2x2x1
jax: 0.10.0
libtpu: 0.0.40
codegen_flags: <defaults>
</compile_context>

<pallas_src>
import functools

import jax
import jax.numpy as jnp
from jax import lax
from jax.experimental import pallas as pl
from jax.experimental.pallas import tpu as pltpu


_UNROLL_T_MAX = 32            # fully unroll the recurrence for T <= this


def _round_up(x, m):
    return (x + m - 1) // m * m


# -----------------------------------------------------------------------------
# Gate re-layout helper: interleave fwd/bwd 4H gate blocks into one 8H block
# grouped by gate: [i_f, i_b, f_f, f_b, g_f, g_b, o_f, o_b], each block Hp wide.
# -----------------------------------------------------------------------------
def _regroup_gates(a_f, a_b, Hp):
    lead = a_f.shape[:-1]
    f4 = a_f.reshape(lead + (4, Hp))
    b4 = a_b.reshape(lead + (4, Hp))
    return jnp.stack([f4, b4], axis=-2).reshape(lead + (8 * Hp,))


# -----------------------------------------------------------------------------
# One-time parameter re-layout (128-lane aligned, bf16 MXU operands).
# -----------------------------------------------------------------------------
def pack_params(params, *, compute_dtype=jnp.bfloat16):
    H = params["whh_f"].shape[0]
    L = params["wd"].shape[1]
    Hp = _round_up(H, 64)      # per-direction pad so 2*Hp is a multiple of 128
    Lp = _round_up(L, 128)     # lane-dense label pad

    def pad_gate_cols(w):      # (..., 4H) -> (..., 4Hp): zero-pad inside each gate block
        lead = w.shape[:-1]
        w4 = w.reshape(lead + (4, H))
        w4 = jnp.pad(w4, [(0, 0)] * len(lead) + [(0, 0), (0, Hp - H)])
        return w4.reshape(lead + (4 * Hp,))

    def pad_h_rows(w):         # (H, X) -> (Hp, X)
        return jnp.pad(w, ((0, Hp - H), (0, 0)))

    whh_f = pad_h_rows(pad_gate_cols(params["whh_f"]))      # (Hp, 4Hp)
    whh_b = pad_h_rows(pad_gate_cols(params["whh_b"]))
    zero = jnp.zeros_like(whh_f)
    # Block-"diagonal" recurrent weight: rows 0:Hp multiply h_fwd, rows Hp:2Hp
    # multiply h_bwd; columns grouped by gate with fwd/bwd interleaved.
    whh_bd = jnp.concatenate([_regroup_gates(whh_f, zero, Hp),
                              _regroup_gates(zero, whh_b, Hp)], axis=0)   # (2Hp, 8Hp)

    # Dense Linear(2H -> L): rows 0:Hp hold fwd-hidden rows, rows Hp:2Hp bwd rows;
    # columns zero-padded to Lp so the output store is lane-dense.
    wd = jnp.zeros((2 * Hp, Lp), params["wd"].dtype)
    wd = wd.at[0:H, 0:L].set(params["wd"][0:H])
    wd = wd.at[Hp:Hp + H, 0:L].set(params["wd"][H:2 * H])
    bd = jnp.zeros((1, Lp), jnp.float32).at[:, 0:L].set(params["bd"])

    cd = compute_dtype
    return {
        "wih_f": pad_gate_cols(params["wih_f"]).astype(cd),   # (V, 4Hp)
        "wih_b": pad_gate_cols(params["wih_b"]).astype(cd),
        "b_f": pad_gate_cols(params["b_f"]).astype(cd),       # (1, 4Hp)
        "b_b": pad_gate_cols(params["b_b"]).astype(cd),
        "whh_bd": whh_bd.astype(cd),                          # (2Hp, 8Hp)
        "wd": wd.astype(cd),                                  # (2Hp, Lp)
        "bd": bd,                                             # (1, Lp) f32
        "bigram": params["bigram"],
        "H": H, "H_pad": Hp, "L": L, "L_pad": Lp,
    }


# -----------------------------------------------------------------------------
# Pallas kernel: fused bidirectional LSTM recurrence + lane-dense dense epilogue.
# -----------------------------------------------------------------------------
def _fused_bilstm_kernel(xw_ref,    # (T, Bb, 8*Hp)  bf16 input proj (bias folded)
                         whh_ref,   # (2*Hp, 8*Hp)   bf16 block-diag recurrent weight
                         wd_ref,    # (2*Hp, Lp)     bf16 dense weight
                         bd_ref,    # (1, Lp)        f32  dense bias
                         out_ref,   # (1, T*Bb, Lp)  f32
                         hid_sc):   # (T*Bb, 2*Hp)   bf16 scratch (merged fwd|bwd)
    T, Bb, _ = xw_ref.shape
    Hp2 = whh_ref.shape[0]          # 2*Hp, multiple of 128
    Hp = Hp2 // 2

    whh = whh_ref[...]              # hoisted weight load (bf16)

    # hidden / cell state carried in registers (f32), layout [fwd Hp | bwd Hp]
    h0 = jnp.zeros((Bb, Hp2), jnp.float32)
    c0 = jnp.zeros((Bb, Hp2), jnp.float32)

    def cell(xw_t, h, c):
        # bf16 MXU operands, f32 accumulation; gate math stays f32 (VPU/EUP).
        gates = (jnp.dot(h.astype(jnp.bfloat16), whh,
                         preferred_element_type=jnp.float32)
                 + xw_t.astype(jnp.float32))
        i = jax.nn.sigmoid(gates[:, 0 * Hp2:1 * Hp2])
        f = jax.nn.sigmoid(gates[:, 1 * Hp2:2 * Hp2])
        g = jnp.tanh(gates[:, 2 * Hp2:3 * Hp2])
        o = jax.nn.sigmoid(gates[:, 3 * Hp2:4 * Hp2])
        c = f * c + i * g
        h = o * jnp.tanh(c)
        return h, c

    if T <= _UNROLL_T_MAX:
        # Fully-unrolled fused recurrence: step s = fwd time s AND bwd time T-1-s.
        h, c = h0, c0
        for s in range(T):
            h, c = cell(xw_ref[s], h, c)
            hb = h.astype(jnp.bfloat16)
            hid_sc[s * Bb:(s + 1) * Bb, 0:Hp] = hb[:, 0:Hp]
            hid_sc[(T - 1 - s) * Bb:(T - s) * Bb, Hp:Hp2] = hb[:, Hp:Hp2]
    else:
        # TODO(synk): for very long T, add a time-chunk ("arbitrary") grid axis or
        # pltpu.emit_pipeline so the whole (T, Bb, 8Hp) block need not be VMEM-resident.
        def body(s, carry):
            h, c = carry
            h, c = cell(xw_ref[s], h, c)
            hb = h.astype(jnp.bfloat16)
            rf = pl.multiple_of(s * Bb, Bb)
            rb = pl.multiple_of((T - 1 - s) * Bb, Bb)
            hid_sc[pl.ds(rf, Bb), 0:Hp] = hb[:, 0:Hp]
            hid_sc[pl.ds(rb, Bb), Hp:Hp2] = hb[:, Hp:Hp2]
            return h, c

        unroll = 4 if T % 4 == 0 else (2 if T % 2 == 0 else 1)
        lax.fori_loop(0, T, body, (h0, c0), unroll=unroll)

    # Single dense projection, hoisted out of the serial loop; lane-dense (Lp=128k) store.
    out = (jnp.dot(hid_sc[...], wd_ref[...], preferred_element_type=jnp.float32)
           + bd_ref[...])
    out_ref[0] = out.astype(out_ref.dtype)


# -----------------------------------------------------------------------------
# Per-tile VMEM working set (bytes): double-buffered operands + scratch + weights.
# -----------------------------------------------------------------------------
def _tile_vmem_bytes(T, bb, Hp, Lp):
    xw = 2 * T * bb * 8 * Hp * 2       # bf16 xw tile, double-buffered
    out = 2 * T * bb * Lp * 4          # f32 output tile, double-buffered
    hid = T * bb * 2 * Hp * 2          # merged bf16 hidden scratch (single buffer)
    w = 2 * ((2 * Hp) * (8 * Hp) * 2 + (2 * Hp) * Lp * 2 + Lp * 4)   # weights / bias
    return xw + out + hid + w


# -----------------------------------------------------------------------------
# Wrapper: embedding-style input projection, layout plumbing, bigram broadcast.
# -----------------------------------------------------------------------------
def crf_rnn_forward(inputs, packed, *, block_b=None):
    """inputs: (B, T) int token ids.  Returns (unigram (B,T,L), bigram (B,T,L,L))."""
    B, T = inputs.shape
    Hp, L, Lp = packed["H_pad"], packed["L"], packed["L_pad"]

    try:
        vmem_cap = int(pltpu.get_tpu_info().vmem_capacity_bytes)
    except Exception:                  # conservative fallback if query unavailable
        vmem_cap = 64 << 20
    budget = min(int(vmem_cap * 0.7), 100 << 20)

    if block_b is None:
        if B >= 16:
            # v7x (<=64 MiB VMEM, 2 TensorCores): aim for >=2 batch tiles so the
            # "parallel" grid axis shards across cores; v5e/v6e (1 TC, 128 MiB):
            # single largest batch tile that fits (biggest MXU M per serial step).
            two_tc = vmem_cap <= (64 << 20)
            cand = _round_up((B + 1) // 2, 8) if two_tc else _round_up(B, 8)
            while cand > 8 and _tile_vmem_bytes(T, cand, Hp, Lp) > budget:
                cand -= 8
            block_b = cand
        else:
            block_b = B
    B_pad = _round_up(B, block_b)
    n_bt = B_pad // block_b

    # pad the batch with token 0 instead of asserting divisibility
    ids = inputs.astype(jnp.int32)
    if B_pad != B:
        ids = jnp.pad(ids, ((0, B_pad - B), (0, 0)))
    ids_tm = ids.T                                                        # (T, B_pad)

    # Input projections (== one_hot @ W_ih) with bias folded, emitted in bf16; bwd
    # side time-reversed so fused iteration s consumes fwd(t=s) and bwd(t=T-1-s).
    # TODO(synk): for small vocabularies gather the W_ih rows in-kernel (scalar-
    # prefetched ids + VMEM-resident table) to avoid materializing xw through HBM.
    xw_f = jnp.take(packed["wih_f"], ids_tm, axis=0) + packed["b_f"]      # (T,Bp,4Hp)
    xw_b = (jnp.take(packed["wih_b"], ids_tm, axis=0) + packed["b_b"])[::-1]
    xw = _regroup_gates(xw_f, xw_b, Hp)                                   # (T,Bp,8Hp) bf16

    tile_bytes = _tile_vmem_bytes(T, block_b, Hp, Lp)
    vmem_limit = int(min(max(2 * tile_bytes + (4 << 20), 16 << 20),
                         int(vmem_cap * 0.9)))

    out_flat = pl.pallas_call(
        _fused_bilstm_kernel,
        out_shape=jax.ShapeDtypeStruct((n_bt, T * block_b, Lp), jnp.float32),
        grid=(n_bt,),
        in_specs=[
            pl.BlockSpec((T, block_b, 8 * Hp), lambda b: (0, b, 0)),
            pl.BlockSpec((2 * Hp, 8 * Hp), lambda b: (0, 0)),
            pl.BlockSpec((2 * Hp, Lp), lambda b: (0, 0)),
            pl.BlockSpec((1, Lp), lambda b: (0, 0)),
        ],
        out_specs=pl.BlockSpec((1, T * block_b, Lp), lambda b: (b, 0, 0)),
        scratch_shapes=[pltpu.VMEM((T * block_b, 2 * Hp), jnp.bfloat16)],
        compiler_params=pltpu.CompilerParams(
            dimension_semantics=("parallel",),
            vmem_limit_bytes=vmem_limit,
        ),
    )(xw, packed["whh_bd"], packed["wd"], packed["bd"])

    # (n_bt, T*block_b, Lp) -> (B, T, L); row within a tile = t*block_b + local_b
    unigram = (out_flat.reshape(n_bt, T, block_b, Lp)
               .transpose(0, 2, 1, 3)
               .reshape(B_pad, T, Lp)[:B, :, :L])

    # bigram_scores.expand(B, T, L, L) — pure broadcast, no compute
    bigram = jnp.broadcast_to(packed["bigram"], (B, T, L, L))
    return unigram, bigram


# -----------------------------------------------------------------------------
# Deterministic parameter init (synthetic; matches nn.LSTM / nn.Linear shapes).
# -----------------------------------------------------------------------------
def init_params(key, vocab_size, num_hiddens, num_labels):
    H, V, L = num_hiddens, vocab_size, num_labels
    ks = jax.random.split(key, 10)
    s = 1.0 / jnp.sqrt(H)
    return {
        # LSTM weights stored pre-transposed: x @ (V,4H), h @ (H,4H); gate order i,f,g,o
        "wih_f": jax.random.uniform(ks[0], (V, 4 * H), jnp.float32, -s, s),
        "whh_f": jax.random.uniform(ks[1], (H, 4 * H), jnp.float32, -s, s),
        "b_f":   jax.random.uniform(ks[2], (1, 4 * H), jnp.float32, -s, s),  # bias_ih+bias_hh folded
        "wih_b": jax.random.uniform(ks[3], (V, 4 * H), jnp.float32, -s, s),
        "whh_b": jax.random.uniform(ks[4], (H, 4 * H), jnp.float32, -s, s),
        "b_b":   jax.random.uniform(ks[5], (1, 4 * H), jnp.float32, -s, s),
        # Linear(2H -> L): stored as (2H, L) plus (1, L) bias
        "wd":    jax.random.uniform(ks[6], (2 * H, L), jnp.float32, -s, s),
        "bd":    jax.random.uniform(ks[7], (1, L), jnp.float32, -s, s),
        # CRF transition matrix ~ torch.randn(L, L)
        "bigram": jax.random.normal(ks[8], (L, L), jnp.float32),
    }


# -----------------------------------------------------------------------------
# Pure-JAX reference (for correctness check).
# -----------------------------------------------------------------------------
def _reference_forward(inputs, params):
    V = params["wih_f"].shape[0]
    H = params["whh_f"].shape[0]
    L = params["wd"].shape[1]
    B, T = inputs.shape
    x = jax.nn.one_hot(inputs, V, dtype=jnp.float32)

    def run_dir(wih, whh, b, reverse):
        def step(carry, x_t):
            h, c = carry
            gates = x_t @ wih + h @ whh + b
            i = jax.nn.sigmoid(gates[:, 0:H])
            f = jax.nn.sigmoid(gates[:, H:2 * H])
            g = jnp.tanh(gates[:, 2 * H:3 * H])
            o = jax.nn.sigmoid(gates[:, 3 * H:4 * H])
            c = f * c + i * g
            h = o * jnp.tanh(c)
            return (h, c), h
        xs = jnp.swapaxes(x, 0, 1)
        if reverse:
            xs = xs[::-1]
        _, hs = lax.scan(step, (jnp.zeros((B, H)), jnp.zeros((B, H))), xs)
        if reverse:
            hs = hs[::-1]
        return jnp.swapaxes(hs, 0, 1)

    y = jnp.concatenate(
        [run_dir(params["wih_f"], params["whh_f"], params["b_f"], False),
         run_dir(params["wih_b"], params["whh_b"], params["b_b"], True)], axis=-1)
    unigram = y @ params["wd"] + params["bd"]
    bigram = jnp.broadcast_to(params["bigram"], (B, T, L, L))
    return unigram, bigram


if __name__ == "__main__":
    # small shapes consistent with the module
    batch, seq_len = 2, 8
    vocab_size, num_hiddens, num_labels = 16, 32, 5

    key = jax.random.PRNGKey(0)
    k_in, k_par = jax.random.split(key)
    inputs = jax.random.randint(k_in, (batch, seq_len), 0, vocab_size, dtype=jnp.int32)
    params = init_params(k_par, vocab_size, num_hiddens, num_labels)
    packed = pack_params(params)   # one-time weight re-layout (bf16, lane-aligned)

    fwd = jax.jit(functools.partial(crf_rnn_forward, packed=packed))
    unigram, bigram = fwd(inputs)
    jax.block_until_ready((unigram, bigram))

    # correctness check against a pure-JAX f32 reference (bf16 operands -> looser tol)
    ref_uni, ref_bi = _reference_forward(inputs, params)
    assert unigram.shape == (batch, seq_len, num_labels)
    assert bigram.shape == (batch, seq_len, num_labels, num_labels)
    assert jnp.allclose(unigram, ref_uni, atol=3e-2, rtol=3e-2)
    assert jnp.allclose(bigram, ref_bi)

    print("KERNEL_OK")
</pallas_src>

<mosaic_0001>
module attributes {stable_mosaic.version = 11 : i64} {
  func.func @_fused_bilstm_kernel(%arg0: i32, %arg1: memref<8x2x512xbf16, #tpu.memory_space<vmem>>, %arg2: memref<128x512xbf16, #tpu.memory_space<vmem>>, %arg3: memref<128x128xbf16, #tpu.memory_space<vmem>>, %arg4: memref<1x128xf32, #tpu.memory_space<vmem>>, %arg5: memref<1x16x128xf32, #tpu.memory_space<vmem>>, %arg6: memref<16x128xbf16, #tpu.memory_space<vmem>>) attributes {dimension_semantics = [#tpu.dimension_semantics<parallel>], iteration_bounds = array<i64: 1>, scalar_prefetch = 0 : i64, scratch_operands = 1 : i64, tpu.core_type = #tpu.core_type<tc>, window_params = [{transform_indices = @transform_0, window_bounds = array<i64: 8, 2, 512>}, {pipeline_mode = #tpu.pipeline_mode<synchronous>, transform_indices = @transform_1, window_bounds = array<i64: 128, 512>}, {pipeline_mode = #tpu.pipeline_mode<synchronous>, transform_indices = @transform_2, window_bounds = array<i64: 128, 128>}, {pipeline_mode = #tpu.pipeline_mode<synchronous>, transform_indices = @transform_3, window_bounds = array<i64: 1, 128>}, {transform_indices = @transform_4, window_bounds = array<i64: 1, 16, 128>}]} {
    %c0 = arith.constant 0 : index
    %c0_0 = arith.constant 0 : index
    %0 = vector.load %arg2[%c0, %c0_0] : memref<128x512xbf16, #tpu.memory_space<vmem>>, vector<128x512xbf16>
    %cst = arith.constant 0.000000e+00 : f32
    %1 = vector.broadcast %cst : f32 to vector<2x128xf32>
    %cst_1 = arith.constant 0.000000e+00 : f32
    %2 = vector.broadcast %cst_1 : f32 to vector<2x128xf32>
    %c0_2 = arith.constant 0 : index
    %c0_3 = arith.constant 0 : index
    %c0_4 = arith.constant 0 : index
    %3 = vector.load %arg1[%c0_2, %c0_3, %c0_4] : memref<8x2x512xbf16, #tpu.memory_space<vmem>>, vector<1x2x512xbf16>
    %4 = vector.shape_cast %3 : vector<1x2x512xbf16> to vector<2x512xbf16>
    %5 = arith.truncf %1 : vector<2x128xf32> to vector<2x128xbf16>
    %cst_5 = arith.constant dense<0.000000e+00> : vector<2x512xf32>
    %6 = tpu.matmul %5, %0, %cst_5 {dimension_numbers = #tpu.dot_dimension_numbers<[1], [0], [0], [1], [0, 0, 1, 1], [], []>} : vector<2x128xbf16>, vector<128x512xbf16>, vector<2x512xf32> -> vector<2x512xf32>
    %7 = arith.extf %4 : vector<2x512xbf16> to vector<2x512xf32>
    %8 = arith.addf %6, %7 : vector<2x512xf32>
    %9 = vector.extract_strided_slice %8 {offsets = [0, 0], sizes = [2, 128], strides = [1, 1]} : vector<2x512xf32> to vector<2x128xf32>
    %10 = arith.negf %9 : vector<2x128xf32>
    %11 = math.exp %10 : vector<2x128xf32>
    %cst_6 = arith.constant 1.000000e+00 : f32
    %12 = vector.broadcast %cst_6 : f32 to vector<2x128xf32>
    %13 = arith.addf %12, %11 : vector<2x128xf32>
    %14 = arith.divf %12, %13 : vector<2x128xf32>
    %15 = vector.extract_strided_slice %8 {offsets = [0, 128], sizes = [2, 128], strides = [1, 1]} : vector<2x512xf32> to vector<2x128xf32>
    %16 = arith.negf %15 : vector<2x128xf32>
    %17 = math.exp %16 : vector<2x128xf32>
    %cst_7 = arith.constant 1.000000e+00 : f32
    %18 = vector.broadcast %cst_7 : f32 to vector<2x128xf32>
    %19 = arith.addf %18, %17 : vector<2x128xf32>
    %20 = arith.divf %18, %19 : vector<2x128xf32>
    %21 = vector.extract_strided_slice %8 {offsets = [0, 256], sizes = [2, 128], strides = [1, 1]} : vector<2x512xf32> to vector<2x128xf32>
    %22 = math.tanh %21 : vector<2x128xf32>
    %23 = vector.extract_strided_slice %8 {offsets = [0, 384], sizes = [2, 128], strides = [1, 1]} : vector<2x512xf32> to vector<2x128xf32>
    %24 = arith.negf %23 : vector<2x128xf32>
    %25 = math.exp %24 : vector<2x128xf32>
    %cst_8 = arith.constant 1.000000e+00 : f32
    %26 = vector.broadcast %cst_8 : f32 to vector<2x128xf32>
    %27 = arith.addf %26, %25 : vector<2x128xf32>
    %28 = arith.divf %26, %27 : vector<2x128xf32>
    %29 = arith.mulf %20, %2 : vector<2x128xf32>
    %30 = arith.mulf %14, %22 : vector<2x128xf32>
    %31 = arith.addf %29, %30 : vector<2x128xf32>
    %32 = math.tanh %31 : vector<2x128xf32>
    %33 = arith.mulf %28, %32 : vector<2x128xf32>
    %34 = arith.truncf %33 : vector<2x128xf32> to vector<2x128xbf16>
    %35 = vector.extract_strided_slice %34 {offsets = [0, 0], sizes = [2, 64], strides = [1, 1]} : vector<2x128xbf16> to vector<2x64xbf16>
    %c0_9 = arith.constant 0 : index
    %c0_10 = arith.constant 0 : index
    %36 = vector.load %arg6[%c0_9, %c0_10] : memref<16x128xbf16, #tpu.memory_space<vmem>>, vector<2x64xbf16>
    tpu.vector_store %arg6[%c0_9, %c0_10], %35 {strides = array<i32>} : memref<16x128xbf16, #tpu.memory_space<vmem>>, vector<2x64xbf16>,
    %37 = vector.extract_strided_slice %34 {offsets = [0, 64], sizes = [2, 64], strides = [1, 1]} : vector<2x128xbf16> to vector<2x64xbf16>
    %c14 = arith.constant 14 : index
    %c64 = arith.constant 64 : index
    %38 = vector.load %arg6[%c14, %c64] : memref<16x128xbf16, #tpu.memory_space<vmem>>, vector<2x64xbf16>
    tpu.vector_store %arg6[%c14, %c64], %37 {strides = array<i32>} : memref<16x128xbf16, #tpu.memory_space<vmem>>, vector<2x64xbf16>,
    %c1 = arith.constant 1 : index
    %c0_11 = arith.constant 0 : index
    %c0_12 = arith.constant 0 : index
    %39 = vector.load %arg1[%c1, %c0_11, %c0_12] : memref<8x2x512xbf16, #tpu.memory_space<vmem>>, vector<1x2x512xbf16>
    %40 = vector.shape_cast %39 : vector<1x2x512xbf16> to vector<2x512xbf16>
    %41 = arith.truncf %33 : vector<2x128xf32> to vector<2x128xbf16>
    %cst_13 = arith.constant dense<0.000000e+00> : vector<2x512xf32>
    %42 = tpu.matmul %41, %0, %cst_13 {dimension_numbers = #tpu.dot_dimension_numbers<[1], [0], [0], [1], [0, 0, 1, 1], [], []>} : vector<2x128xbf16>, vector<128x512xbf16>, vector<2x512xf32> -> vector<2x512xf32>
    %43 = arith.extf %40 : vector<2x512xbf16> to vector<2x512xf32>
    %44 = arith.addf %42, %43 : vector<2x512xf32>
    %45 = vector.extract_strided_slice %44 {offsets = [0, 0], sizes = [2, 128], strides = [1, 1]} : vector<2x512xf32> to vector<2x128xf32>
    %46 = arith.negf %45 : vector<2x128xf32>
    %47 = math.exp %46 : vector<2x128xf32>
    %cst_14 = arith.constant 1.000000e+00 : f32
    %48 = vector.broadcast %cst_14 : f32 to vector<2x128xf32>
    %49 = arith.addf %48, %47 : vector<2x128xf32>
    %50 = arith.divf %48, %49 : vector<2x128xf32>
    %51 = vector.extract_strided_slice %44 {offsets = [0, 128], sizes = [2, 128], strides = [1, 1]} : vector<2x512xf32> to vector<2x128xf32>
    %52 = arith.negf %51 : vector<2x128xf32>
    %53 = math.exp %52 : vector<2x128xf32>
    %cst_15 = arith.constant 1.000000e+00 : f32
    %54 = vector.broadcast %cst_15 : f32 to vector<2x128xf32>
    %55 = arith.addf %54, %53 : vector<2x128xf32>
    %56 = arith.divf %54, %55 : vector<2x128xf32>
    %57 = vector.extract_strided_slice %44 {offsets = [0, 256], sizes = [2, 128], strides = [1, 1]} : vector<2x512xf32> to vector<2x128xf32>
    %58 = math.tanh %57 : vector<2x128xf32>
    %59 = vector.extract_strided_slice %44 {offsets = [0, 384], sizes = [2, 128], strides = [1, 1]} : vector<2x512xf32> to vector<2x128xf32>
    %60 = arith.negf %59 : vector<2x128xf32>
    %61 = math.exp %60 : vector<2x128xf32>
    %cst_16 = arith.constant 1.000000e+00 : f32
    %62 = vector.broadcast %cst_16 : f32 to vector<2x128xf32>
    %63 = arith.addf %62, %61 : vector<2x128xf32>
    %64 = arith.divf %62, %63 : vector<2x128xf32>
    %65 = arith.mulf %56, %31 : vector<2x128xf32>
    %66 = arith.mulf %50, %58 : vector<2x128xf32>
    %67 = arith.addf %65, %66 : vector<2x128xf32>
    %68 = math.tanh %67 : vector<2x128xf32>
    %69 = arith.mulf %64, %68 : vector<2x128xf32>
    %70 = arith.truncf %69 : vector<2x128xf32> to vector<2x128xbf16>
    %71 = vector.extract_strided_slice %70 {offsets = [0, 0], sizes = [2, 64], strides = [1, 1]} : vector<2x128xbf16> to vector<2x64xbf16>
    %c2 = arith.constant 2 : index
    %c0_17 = arith.constant 0 : index
    %72 = vector.load %arg6[%c2, %c0_17] : memref<16x128xbf16, #tpu.memory_space<vmem>>, vector<2x64xbf16>
    tpu.vector_store %arg6[%c2, %c0_17], %71 {strides = array<i32>} : memref<16x128xbf16, #tpu.memory_space<vmem>>, vector<2x64xbf16>,
    %73 = vector.extract_strided_slice %70 {offsets = [0, 64], sizes = [2, 64], strides = [1, 1]} : vector<2x128xbf16> to vector<2x64xbf16>
    %c12 = arith.constant 12 : index
    %c64_18 = arith.constant 64 : index
    %74 = vector.load %arg6[%c12, %c64_18] : memref<16x128xbf16, #tpu.memory_space<vmem>>, vector<2x64xbf16>
    tpu.vector_store %arg6[%c12, %c64_18], %73 {strides = array<i32>} : memref<16x128xbf16, #tpu.memory_space<vmem>>, vector<2x64xbf16>,
    %c2_19 = arith.constant 2 : index
    %c0_20 = arith.constant 0 : index
    %c0_21 = arith.constant 0 : index
    %75 = vector.load %arg1[%c2_19, %c0_20, %c0_21] : memref<8x2x512xbf16, #tpu.memory_space<vmem>>, vector<1x2x512xbf16>
    %76 = vector.shape_cast %75 : vector<1x2x512xbf16> to vector<2x512xbf16>
    %77 = arith.truncf %69 : vector<2x128xf32> to vector<2x128xbf16>
    %cst_22 = arith.constant dense<0.000000e+00> : vector<2x512xf32>
    %78 = tpu.matmul %77, %0, %cst_22 {dimension_numbers = #tpu.dot_dimension_numbers<[1], [0], [0], [1], [0, 0, 1, 1], [], []>} : vector<2x128xbf16>, vector<128x512xbf16>, vector<2x512xf32> -> vector<2x512xf32>
    %79 = arith.extf %76 : vector<2x512xbf16> to vector<2x512xf32>
    %80 = arith.addf %78, %79 : vector<2x512xf32>
    %81 = vector.extract_strided_slice %80 {offsets = [0, 0], sizes = [2, 128], strides = [1, 1]} : vector<2x512xf32> to vector<2x128xf32>
    %82 = arith.negf %81 : vector<2x128xf32>
    %83 = math.exp %82 : vector<2x128xf32>
    %cst_23 = arith.constant 1.000000e+00 : f32
    %84 = vector.broadcast %cst_23 : f32 to vector<2x128xf32>
    %85 = arith.addf %84, %83 : vector<2x128xf32>
    %86 = arith.divf %84, %85 : vector<2x128xf32>
    %87 = vector.extract_strided_slice %80 {offsets = [0, 128], sizes = [2, 128], strides = [1, 1]} : vector<2x512xf32> to vector<2x128xf32>
    %88 = arith.negf %87 : vector<2x128xf32>
    %89 = math.exp %88 : vector<2x128xf32>
    %cst_24 = arith.constant 1.000000e+00 : f32
    %90 = vector.broadcast %cst_24 : f32 to vector<2x128xf32>
    %91 = arith.addf %90, %89 : vector<2x128xf32>
    %92 = arith.divf %90, %91 : vector<2x128xf32>
    %93 = vector.extract_strided_slice %80 {offsets = [0, 256], sizes = [2, 128], strides = [1, 1]} : vector<2x512xf32> to vector<2x128xf32>
    %94 = math.tanh %93 : vector<2x128xf32>
    %95 = vector.extract_strided_slice %80 {offsets = [0, 384], sizes = [2, 128], strides = [1, 1]} : vector<2x512xf32> to vector<2x128xf32>
    %96 = arith.negf %95 : vector<2x128xf32>
    %97 = math.exp %96 : vector<2x128xf32>
    %cst_25 = arith.constant 1.000000e+00 : f32
    %98 = vector.broadcast %cst_25 : f32 to vector<2x128xf32>
    %99 = arith.addf %98, %97 : vector<2x128xf32>
    %100 = arith.divf %98, %99 : vector<2x128xf32>
    %101 = arith.mulf %92, %67 : vector<2x128xf32>
    %102 = arith.mulf %86, %94 : vector<2x128xf32>
    %103 = arith.addf %101, %102 : vector<2x128xf32>
    %104 = math.tanh %103 : vector<2x128xf32>
    %105 = arith.mulf %100, %104 : vector<2x128xf32>
    %106 = arith.truncf %105 : vector<2x128xf32> to vector<2x128xbf16>
    %107 = vector.extract_strided_slice %106 {offsets = [0, 0], sizes = [2, 64], strides = [1, 1]} : vector<2x128xbf16> to vector<2x64xbf16>
    %c4 = arith.constant 4 : index
    %c0_26 = arith.constant 0 : index
    %108 = vector.load %arg6[%c4, %c0_26] : memref<16x128xbf16, #tpu.memory_space<vmem>>, vector<2x64xbf16>
    tpu.vector_store %arg6[%c4, %c0_26], %107 {strides = array<i32>} : memref<16x128xbf16, #tpu.memory_space<vmem>>, vector<2x64xbf16>,
    %109 = vector.extract_strided_slice %106 {offsets = [0, 64], sizes = [2, 64], strides = [1, 1]} : vector<2x128xbf16> to vector<2x64xbf16>
    %c10 = arith.constant 10 : index
    %c64_27 = arith.constant 64 : index
    %110 = vector.load %arg6[%c10, %c64_27] : memref<16x128xbf16, #tpu.memory_space<vmem>>, vector<2x64xbf16>
    tpu.vector_store %arg6[%c10, %c64_27], %109 {strides = array<i32>} : memref<16x128xbf16, #tpu.memory_space<vmem>>, vector<2x64xbf16>,
    %c3 = arith.constant 3 : index
    %c0_28 = arith.constant 0 : index
    %c0_29 = arith.constant 0 : index
    %111 = vector.load %arg1[%c3, %c0_28, %c0_29] : memref<8x2x512xbf16, #tpu.memory_space<vmem>>, vector<1x2x512xbf16>
    %112 = vector.shape_cast %111 : vector<1x2x512xbf16> to vector<2x512xbf16>
    %113 = arith.truncf %105 : vector<2x128xf32> to vector<2x128xbf16>
    %cst_30 = arith.constant dense<0.000000e+00> : vector<2x512xf32>
    %114 = tpu.matmul %113, %0, %cst_30 {dimension_numbers = #tpu.dot_dimension_numbers<[1], [0], [0], [1], [0, 0, 1, 1], [], []>} : vector<2x128xbf16>, vector<128x512xbf16>, vector<2x512xf32> -> vector<2x512xf32>
    %115 = arith.extf %112 : vector<2x512xbf16> to vector<2x512xf32>
    %116 = arith.addf %114, %115 : vector<2x512xf32>
    %117 = vector.extract_strided_slice %116 {offsets = [0, 0], sizes = [2, 128], strides = [1, 1]} : vector<2x512xf32> to vector<2x128xf32>
    %118 = arith.negf %117 : vector<2x128xf32>
    %119 = math.exp %118 : vector<2x128xf32>
    %cst_31 = arith.constant 1.000000e+00 : f32
    %120 = vector.broadcast %cst_31 : f32 to vector<2x128xf32>
    %121 = arith.addf %120, %119 : vector<2x128xf32>
    %122 = arith.divf %120, %121 : vector<2x128xf32>
    %123 = vector.extract_strided_slice %116 {offsets = [0, 128], sizes = [2, 128], strides = [1, 1]} : vector<2x512xf32> to vector<2x128xf32>
    %124 = arith.negf %123 : vector<2x128xf32>
    %125 = math.exp %124 : vector<2x128xf32>
    %cst_32 = arith.constant 1.000000e+00 : f32
    %126 = vector.broadcast %cst_32 : f32 to vector<2x128xf32>
    %127 = arith.addf %126, %125 : vector<2x128xf32>
    %128 = arith.divf %126, %127 : vector<2x128xf32>
    %129 = vector.extract_strided_slice %116 {offsets = [0, 256], sizes = [2, 128], strides = [1, 1]} : vector<2x512xf32> to vector<2x128xf32>
    %130 = math.tanh %129 : vector<2x128xf32>
    %131 = vector.extract_strided_slice %116 {offsets = [0, 384], sizes = [2, 128], strides = [1, 1]} : vector<2x512xf32> to vector<2x128xf32>
    %132 = arith.negf %131 : vector<2x128xf32>
    %133 = math.exp %132 : vector<2x128xf32>
    %cst_33 = arith.constant 1.000000e+00 : f32
    %134 = vector.broadcast %cst_33 : f32 to vector<2x128xf32>
    %135 = arith.addf %134, %133 : vector<2x128xf32>
    %136 = arith.divf %134, %135 : vector<2x128xf32>
    %137 = arith.mulf %128, %103 : vector<2x128xf32>
    %138 = arith.mulf %122, %130 : vector<2x128xf32>
    %139 = arith.addf %137, %138 : vector<2x128xf32>
    %140 = math.tanh %139 : vector<2x128xf32>
    %141 = arith.mulf %136, %140 : vector<2x128xf32>
    %142 = arith.truncf %141 : vector<2x128xf32> to vector<2x128xbf16>
    %143 = vector.extract_strided_slice %142 {offsets = [0, 0], sizes = [2, 64], strides = [1, 1]} : vector<2x128xbf16> to vector<2x64xbf16>
    %c6 = arith.constant 6 : index
    %c0_34 = arith.constant 0 : index
    %144 = vector.load %arg6[%c6, %c0_34] : memref<16x128xbf16, #tpu.memory_space<vmem>>, vector<2x64xbf16>
    tpu.vector_store %arg6[%c6, %c0_34], %143 {strides = array<i32>} : memref<16x128xbf16, #tpu.memory_space<vmem>>, vector<2x64xbf16>,
    %145 = vector.extract_strided_slice %142 {offsets = [0, 64], sizes = [2, 64], strides = [1, 1]} : vector<2x128xbf16> to vector<2x64xbf16>
    %c8 = arith.constant 8 : index
    %c64_35 = arith.constant 64 : index
    %146 = vector.load %arg6[%c8, %c64_35] : memref<16x128xbf16, #tpu.memory_space<vmem>>, vector<2x64xbf16>
    tpu.vector_store %arg6[%c8, %c64_35], %145 {strides = array<i32>} : memref<16x128xbf16, #tpu.memory_space<vmem>>, vector<2x64xbf16>,
    %c4_36 = arith.constant 4 : index
    %c0_37 = arith.constant 0 : index
    %c0_38 = arith.constant 0 : index
    %147 = vector.load %arg1[%c4_36, %c0_37, %c0_38] : memref<8x2x512xbf16, #tpu.memory_space<vmem>>, vector<1x2x512xbf16>
    %148 = vector.shape_cast %147 : vector<1x2x512xbf16> to vector<2x512xbf16>
    %149 = arith.truncf %141 : vector<2x128xf32> to vector<2x128xbf16>
    %cst_39 = arith.constant dense<0.000000e+00> : vector<2x512xf32>
    %150 = tpu.matmul %149, %0, %cst_39 {dimension_numbers = #tpu.dot_dimension_numbers<[1], [0], [0], [1], [0, 0, 1, 1], [], []>} : vector<2x128xbf16>, vector<128x512xbf16>, vector<2x512xf32> -> vector<2x512xf32>
    %151 = arith.extf %148 : vector<2x512xbf16> to vector<2x512xf32>
    %152 = arith.addf %150, %151 : vector<2x512xf32>
    %153 = vector.extract_strided_slice %152 {offsets = [0, 0], sizes = [2, 128], strides = [1, 1]} : vector<2x512xf32> to vector<2x128xf32>
    %154 = arith.negf %153 : vector<2x128xf32>
    %155 = math.exp %154 : vector<2x128xf32>
    %cst_40 = arith.constant 1.000000e+00 : f32
    %156 = vector.broadcast %cst_40 : f32 to vector<2x128xf32>
    %157 = arith.addf %156, %155 : vector<2x128xf32>
    %158 = arith.divf %156, %157 : vector<2x128xf32>
    %159 = vector.extract_strided_slice %152 {offsets = [0, 128], sizes = [2, 128], strides = [1, 1]} : vector<2x512xf32> to vector<2x128xf32>
    %160 = arith.negf %159 : vector<2x128xf32>
    %161 = math.exp %160 : vector<2x128xf32>
    %cst_41 = arith.constant 1.000000e+00 : f32
    %162 = vector.broadcast %cst_41 : f32 to vector<2x128xf32>
    %163 = arith.addf %162, %161 : vector<2x128xf32>
    %164 = arith.divf %162, %163 : vector<2x128xf32>
    %165 = vector.extract_strided_slice %152 {offsets = [0, 256], sizes = [2, 128], strides = [1, 1]} : vector<2x512xf32> to vector<2x128xf32>
    %166 = math.tanh %165 : vector<2x128xf32>
    %167 = vector.extract_strided_slice %152 {offsets = [0, 384], sizes = [2, 128], strides = [1, 1]} : vector<2x512xf32> to vector<2x128xf32>
    %168 = arith.negf %167 : vector<2x128xf32>
    %169 = math.exp %168 : vector<2x128xf32>
    %cst_42 = arith.constant 1.000000e+00 : f32
    %170 = vector.broadcast %cst_42 : f32 to vector<2x128xf32>
    %171 = arith.addf %170, %169 : vector<2x128xf32>
    %172 = arith.divf %170, %171 : vector<2x128xf32>
    %173 = arith.mulf %164, %139 : vector<2x128xf32>
    %174 = arith.mulf %158, %166 : vector<2x128xf32>
    %175 = arith.addf %173, %174 : vector<2x128xf32>
    %176 = math.tanh %175 : vector<2x128xf32>
    %177 = arith.mulf %172, %176 : vector<2x128xf32>
    %178 = arith.truncf %177 : vector<2x128xf32> to vector<2x128xbf16>
    %179 = vector.extract_strided_slice %178 {offsets = [0, 0], sizes = [2, 64], strides = [1, 1]} : vector<2x128xbf16> to vector<2x64xbf16>
    %c8_43 = arith.constant 8 : index
    %c0_44 = arith.constant 0 : index
    %180 = vector.load %arg6[%c8_43, %c0_44] : memref<16x128xbf16, #tpu.memory_space<vmem>>, vector<2x64xbf16>
    tpu.vector_store %arg6[%c8_43, %c0_44], %179 {strides = array<i32>} : memref<16x128xbf16, #tpu.memory_space<vmem>>, vector<2x64xbf16>,
    %181 = vector.extract_strided_slice %178 {offsets = [0, 64], sizes = [2, 64], strides = [1, 1]} : vector<2x128xbf16> to vector<2x64xbf16>
    %c6_45 = arith.constant 6 : index
    %c64_46 = arith.constant 64 : index
    %182 = vector.load %arg6[%c6_45, %c64_46] : memref<16x128xbf16, #tpu.memory_space<vmem>>, vector<2x64xbf16>
    tpu.vector_store %arg6[%c6_45, %c64_46], %181 {strides = array<i32>} : memref<16x128xbf16, #tpu.memory_space<vmem>>, vector<2x64xbf16>,
    %c5 = arith.constant 5 : index
    %c0_47 = arith.constant 0 : index
    %c0_48 = arith.constant 0 : index
    %183 = vector.load %arg1[%c5, %c0_47, %c0_48] : memref<8x2x512xbf16, #tpu.memory_space<vmem>>, vector<1x2x512xbf16>
    %184 = vector.shape_cast %183 : vector<1x2x512xbf16> to vector<2x512xbf16>
    %185 = arith.truncf %177 : vector<2x128xf32> to vector<2x128xbf16>
    %cst_49 = arith.constant dense<0.000000e+00> : vector<2x512xf32>
    %186 = tpu.matmul %185, %0, %cst_49 {dimension_numbers = #tpu.dot_dimension_numbers<[1], [0], [0], [1], [0, 0, 1, 1], [], []>} : vector<2x128xbf16>, vector<128x512xbf16>, vector<2x512xf32> -> vector<2x512xf32>
    %187 = arith.extf %184 : vector<2x512xbf16> to vector<2x512xf32>
    %188 = arith.addf %186, %187 : vector<2x512xf32>
    %189 = vector.extract_strided_slice %188 {offsets = [0, 0], sizes = [2, 128], strides = [1, 1]} : vector<2x512xf32> to vector<2x128xf32>
    %190 = arith.negf %189 : vector<2x128xf32>
    %191 = math.exp %190 : vector<2x128xf32>
    %cst_50 = arith.constant 1.000000e+00 : f32
    %192 = vector.broadcast %cst_50 : f32 to vector<2x128xf32>
    %193 = arith.addf %192, %191 : vector<2x128xf32>
    %194 = arith.divf %192, %193 : vector<2x128xf32>
    %195 = vector.extract_strided_slice %188 {offsets = [0, 128], sizes = [2, 128], strides = [1, 1]} : vector<2x512xf32> to vector<2x128xf32>
    %196 = arith.negf %195 : vector<2x128xf32>
    %197 = math.exp %196 : vector<2x128xf32>
    %cst_51 = arith.constant 1.000000e+00 : f32
    %198 = vector.broadcast %cst_51 : f32 to vector<2x128xf32>
    %199 = arith.addf %198, %197 : vector<2x128xf32>
    %200 = arith.divf %198, %199 : vector<2x128xf32>
    %201 = vector.extract_strided_slice %188 {offsets = [0, 256], sizes = [2, 128], strides = [1, 1]} : vector<2x512xf32> to vector<2x128xf32>
    %202 = math.tanh %201 : vector<2x128xf32>
    %203 = vector.extract_strided_slice %188 {offsets = [0, 384], sizes = [2, 128], strides = [1, 1]} : vector<2x512xf32> to vector<2x128xf32>
    %204 = arith.negf %203 : vector<2x128xf32>
    %205 = math.exp %204 : vector<2x128xf32>
    %cst_52 = arith.constant 1.000000e+00 : f32
    %206 = vector.broadcast %cst_52 : f32 to vector<2x128xf32>
    %207 = arith.addf %206, %205 : vector<2x128xf32>
    %208 = arith.divf %206, %207 : vector<2x128xf32>
    %209 = arith.mulf %200, %175 : vector<2x128xf32>
    %210 = arith.mulf %194, %202 : vector<2x128xf32>
    %211 = arith.addf %209, %210 : vector<2x128xf32>
    %212 = math.tanh %211 : vector<2x128xf32>
    %213 = arith.mulf %208, %212 : vector<2x128xf32>
    %214 = arith.truncf %213 : vector<2x128xf32> to vector<2x128xbf16>
    %215 = vector.extract_strided_slice %214 {offsets = [0, 0], sizes = [2, 64], strides = [1, 1]} : vector<2x128xbf16> to vector<2x64xbf16>
    %c10_53 = arith.constant 10 : index
    %c0_54 = arith.constant 0 : index
    %216 = vector.load %arg6[%c10_53, %c0_54] : memref<16x128xbf16, #tpu.memory_space<vmem>>, vector<2x64xbf16>
    tpu.vector_store %arg6[%c10_53, %c0_54], %215 {strides = array<i32>} : memref<16x128xbf16, #tpu.memory_space<vmem>>, vector<2x64xbf16>,
    %217 = vector.extract_strided_slice %214 {offsets = [0, 64], sizes = [2, 64], strides = [1, 1]} : vector<2x128xbf16> to vector<2x64xbf16>
    %c4_55 = arith.constant 4 : index
    %c64_56 = arith.constant 64 : index
    %218 = vector.load %arg6[%c4_55, %c64_56] : memref<16x128xbf16, #tpu.memory_space<vmem>>, vector<2x64xbf16>
    tpu.vector_store %arg6[%c4_55, %c64_56], %217 {strides = array<i32>} : memref<16x128xbf16, #tpu.memory_space<vmem>>, vector<2x64xbf16>,
    %c6_57 = arith.constant 6 : index
    %c0_58 = arith.constant 0 : index
    %c0_59 = arith.constant 0 : index
    %219 = vector.load %arg1[%c6_57, %c0_58, %c0_59] : memref<8x2x512xbf16, #tpu.memory_space<vmem>>, vector<1x2x512xbf16>
    %220 = vector.shape_cast %219 : vector<1x2x512xbf16> to vector<2x512xbf16>
    %221 = arith.truncf %213 : vector<2x128xf32> to vector<2x128xbf16>
    %cst_60 = arith.constant dense<0.000000e+00> : vector<2x512xf32>
    %222 = tpu.matmul %221, %0, %cst_60 {dimension_numbers = #tpu.dot_dimension_numbers<[1], [0], [0], [1], [0, 0, 1, 1], [], []>} : vector<2x128xbf16>, vector<128x512xbf16>, vector<2x512xf32> -> vector<2x512xf32>
    %223 = arith.extf %220 : vector<2x512xbf16> to vector<2x512xf32>
    %224 = arith.addf %222, %223 : vector<2x512xf32>
    %225 = vector.extract_strided_slice %224 {offsets = [0, 0], sizes = [2, 128], strides = [1, 1]} : vector<2x512xf32> to vector<2x128xf32>
    %226 = arith.negf %225 : vector<2x128xf32>
    %227 = math.exp %226 : vector<2x128xf32>
    %cst_61 = arith.constant 1.000000e+00 : f32
    %228 = vector.broadcast %cst_61 : f32 to vector<2x128xf32>
    %229 = arith.addf %228, %227 : vector<2x128xf32>
    %230 = arith.divf %228, %229 : vector<2x128xf32>
    %231 = vector.extract_strided_slice %224 {offsets = [0, 128], sizes = [2, 128], strides = [1, 1]} : vector<2x512xf32> to vector<2x128xf32>
    %232 = arith.negf %231 : vector<2x128xf32>
    %233 = math.exp %232 : vector<2x128xf32>
    %cst_62 = arith.constant 1.000000e+00 : f32
    %234 = vector.broadcast %cst_62 : f32 to vector<2x128xf32>
    %235 = arith.addf %234, %233 : vector<2x128xf32>
    %236 = arith.divf %234, %235 : vector<2x128xf32>
    %237 = vector.extract_strided_slice %224 {offsets = [0, 256], sizes = [2, 128], strides = [1, 1]} : vector<2x512xf32> to vector<2x128xf32>
    %238 = math.tanh %237 : vector<2x128xf32>
    %239 = vector.extract_strided_slice %224 {offsets = [0, 384], sizes = [2, 128], strides = [1, 1]} : vector<2x512xf32> to vector<2x128xf32>
    %240 = arith.negf %239 : vector<2x128xf32>
    %241 = math.exp %240 : vector<2x128xf32>
    %cst_63 = arith.constant 1.000000e+00 : f32
    %242 = vector.broadcast %cst_63 : f32 to vector<2x128xf32>
    %243 = arith.addf %242, %241 : vector<2x128xf32>
    %244 = arith.divf %242, %243 : vector<2x128xf32>
    %245 = arith.mulf %236, %211 : vector<2x128xf32>
    %246 = arith.mulf %230, %238 : vector<2x128xf32>
    %247 = arith.addf %245, %246 : vector<2x128xf32>
    %248 = math.tanh %247 : vector<2x128xf32>
    %249 = arith.mulf %244, %248 : vector<2x128xf32>
    %250 = arith.truncf %249 : vector<2x128xf32> to vector<2x128xbf16>
    %251 = vector.extract_strided_slice %250 {offsets = [0, 0], sizes = [2, 64], strides = [1, 1]} : vector<2x128xbf16> to vector<2x64xbf16>
    %c12_64 = arith.constant 12 : index
    %c0_65 = arith.constant 0 : index
    %252 = vector.load %arg6[%c12_64, %c0_65] : memref<16x128xbf16, #tpu.memory_space<vmem>>, vector<2x64xbf16>
    tpu.vector_store %arg6[%c12_64, %c0_65], %251 {strides = array<i32>} : memref<16x128xbf16, #tpu.memory_space<vmem>>, vector<2x64xbf16>,
    %253 = vector.extract_strided_slice %250 {offsets = [0, 64], sizes = [2, 64], strides = [1, 1]} : vector<2x128xbf16> to vector<2x64xbf16>
    %c2_66 = arith.constant 2 : index
    %c64_67 = arith.constant 64 : index
    %254 = vector.load %arg6[%c2_66, %c64_67] : memref<16x128xbf16, #tpu.memory_space<vmem>>, vector<2x64xbf16>
    tpu.vector_store %arg6[%c2_66, %c64_67], %253 {strides = array<i32>} : memref<16x128xbf16, #tpu.memory_space<vmem>>, vector<2x64xbf16>,
    %c7 = arith.constant 7 : index
    %c0_68 = arith.constant 0 : index
    %c0_69 = arith.constant 0 : index
    %255 = vector.load %arg1[%c7, %c0_68, %c0_69] : memref<8x2x512xbf16, #tpu.memory_space<vmem>>, vector<1x2x512xbf16>
    %256 = vector.shape_cast %255 : vector<1x2x512xbf16> to vector<2x512xbf16>
    %257 = arith.truncf %249 : vector<2x128xf32> to vector<2x128xbf16>
    %cst_70 = arith.constant dense<0.000000e+00> : vector<2x512xf32>
    %258 = tpu.matmul %257, %0, %cst_70 {dimension_numbers = #tpu.dot_dimension_numbers<[1], [0], [0], [1], [0, 0, 1, 1], [], []>} : vector<2x128xbf16>, vector<128x512xbf16>, vector<2x512xf32> -> vector<2x512xf32>
    %259 = arith.extf %256 : vector<2x512xbf16> to vector<2x512xf32>
    %260 = arith.addf %258, %259 : vector<2x512xf32>
    %261 = vector.extract_strided_slice %260 {offsets = [0, 0], sizes = [2, 128], strides = [1, 1]} : vector<2x512xf32> to vector<2x128xf32>
    %262 = arith.negf %261 : vector<2x128xf32>
    %263 = math.exp %262 : vector<2x128xf32>
    %cst_71 = arith.constant 1.000000e+00 : f32
    %264 = vector.broadcast %cst_71 : f32 to vector<2x128xf32>
    %265 = arith.addf %264, %263 : vector<2x128xf32>
    %266 = arith.divf %264, %265 : vector<2x128xf32>
    %267 = vector.extract_strided_slice %260 {offsets = [0, 128], sizes = [2, 128], strides = [1, 1]} : vector<2x512xf32> to vector<2x128xf32>
    %268 = arith.negf %267 : vector<2x128xf32>
    %269 = math.exp %268 : vector<2x128xf32>
    %cst_72 = arith.constant 1.000000e+00 : f32
    %270 = vector.broadcast %cst_72 : f32 to vector<2x128xf32>
    %271 = arith.addf %270, %269 : vector<2x128xf32>
    %272 = arith.divf %270, %271 : vector<2x128xf32>
    %273 = vector.extract_strided_slice %260 {offsets = [0, 256], sizes = [2, 128], strides = [1, 1]} : vector<2x512xf32> to vector<2x128xf32>
    %274 = math.tanh %273 : vector<2x128xf32>
    %275 = vector.extract_strided_slice %260 {offsets = [0, 384], sizes = [2, 128], strides = [1, 1]} : vector<2x512xf32> to vector<2x128xf32>
    %276 = arith.negf %275 : vector<2x128xf32>
    %277 = math.exp %276 : vector<2x128xf32>
    %cst_73 = arith.constant 1.000000e+00 : f32
    %278 = vector.broadcast %cst_73 : f32 to vector<2x128xf32>
    %279 = arith.addf %278, %277 : vector<2x128xf32>
    %280 = arith.divf %278, %279 : vector<2x128xf32>
    %281 = arith.mulf %272, %247 : vector<2x128xf32>
    %282 = arith.mulf %266, %274 : vector<2x128xf32>
    %283 = arith.addf %281, %282 : vector<2x128xf32>
    %284 = math.tanh %283 : vector<2x128xf32>
    %285 = arith.mulf %280, %284 : vector<2x128xf32>
    %286 = arith.truncf %285 : vector<2x128xf32> to vector<2x128xbf16>
    %287 = vector.extract_strided_slice %286 {offsets = [0, 0], sizes = [2, 64], strides = [1, 1]} : vector<2x128xbf16> to vector<2x64xbf16>
    %c14_74 = arith.constant 14 : index
    %c0_75 = arith.constant 0 : index
    %288 = vector.load %arg6[%c14_74, %c0_75] : memref<16x128xbf16, #tpu.memory_space<vmem>>, vector<2x64xbf16>
    tpu.vector_store %arg6[%c14_74, %c0_75], %287 {strides = array<i32>} : memref<16x128xbf16, #tpu.memory_space<vmem>>, vector<2x64xbf16>,
    %289 = vector.extract_strided_slice %286 {offsets = [0, 64], sizes = [2, 64], strides = [1, 1]} : vector<2x128xbf16> to vector<2x64xbf16>
    %c0_76 = arith.constant 0 : index
    %c64_77 = arith.constant 64 : index
    %290 = vector.load %arg6[%c0_76, %c64_77] : memref<16x128xbf16, #tpu.memory_space<vmem>>, vector<2x64xbf16>
    tpu.vector_store %arg6[%c0_76, %c64_77], %289 {strides = array<i32>} : memref<16x128xbf16, #tpu.memory_space<vmem>>, vector<2x64xbf16>,
    %c0_78 = arith.constant 0 : index
    %c0_79 = arith.constant 0 : index
    %291 = vector.load %arg6[%c0_78, %c0_79] : memref<16x128xbf16, #tpu.memory_space<vmem>>, vector<16x128xbf16>
    %c0_80 = arith.constant 0 : index
    %c0_81 = arith.constant 0 : index
    %292 = vector.load %arg3[%c0_80, %c0_81] : memref<128x128xbf16, #tpu.memory_space<vmem>>, vector<128x128xbf16>
    %cst_82 = arith.constant dense<0.000000e+00> : vector<16x128xf32>
    %293 = tpu.matmul %291, %292, %cst_82 {dimension_numbers = #tpu.dot_dimension_numbers<[1], [0], [0], [1], [0, 0, 1, 1], [], []>} : vector<16x128xbf16>, vector<128x128xbf16>, vector<16x128xf32> -> vector<16x128xf32>
    %c0_83 = arith.constant 0 : index
    %c0_84 = arith.constant 0 : index
    %294 = vector.load %arg4[%c0_83, %c0_84] : memref<1x128xf32, #tpu.memory_space<vmem>>, vector<1x128xf32>
    %295 = vector.broadcast %294 : vector<1x128xf32> to vector<16x128xf32>
    %296 = arith.addf %293, %295 : vector<16x128xf32>
    %c0_85 = arith.constant 0 : index
    %c0_86 = arith.constant 0 : index
    %c0_87 = arith.constant 0 : index
    %297 = vector.load %arg5[%c0_85, %c0_86, %c0_87] : memref<1x16x128xf32, #tpu.memory_space<vmem>>, vector<1x16x128xf32>
    %298 = vector.shape_cast %297 : vector<1x16x128xf32> to vector<16x128xf32>
    %299 = vector.shape_cast %296 : vector<16x128xf32> to vector<1x16x128xf32>
    tpu.vector_store %arg5[%c0_85, %c0_86, %c0_87], %299 {strides = array<i32>} : memref<1x16x128xf32, #tpu.memory_space<vmem>>, vector<1x16x128xf32>,
    return
  }
  func.func @transform_0(%arg0: i32) -> (i32, i32, i32) {
    %c0_i32 = arith.constant 0 : i32
    %c0_i32_0 = arith.constant 0 : i32
    %c0_i32_1 = arith.constant 0 : i32
    return %c0_i32, %arg0, %c0_i32_0 : i32, i32, i32
  }
  func.func @transform_1(%arg0: i32) -> (i32, i32) {
    %c0_i32 = arith.constant 0 : i32
    %c0_i32_0 = arith.constant 0 : i32
    %c0_i32_1 = arith.constant 0 : i32
    return %c0_i32, %c0_i32_0 : i32, i32
  }
  func.func @transform_2(%arg0: i32) -> (i32, i32) {
    %c0_i32 = arith.constant 0 : i32
    %c0_i32_0 = arith.constant 0 : i32
    %c0_i32_1 = arith.constant 0 : i32
    return %c0_i32, %c0_i32_0 : i32, i32
  }
  func.func @transform_3(%arg0: i32) -> (i32, i32) {
    %c0_i32 = arith.constant 0 : i32
    %c0_i32_0 = arith.constant 0 : i32
    %c0_i32_1 = arith.constant 0 : i32
    return %c0_i32, %c0_i32_0 : i32, i32
  }
  func.func @transform_4(%arg0: i32) -> (i32, i32, i32) {
    %c0_i32 = arith.constant 0 : i32
    %c0_i32_0 = arith.constant 0 : i32
    %c0_i32_1 = arith.constant 0 : i32
    return %arg0, %c0_i32, %c0_i32_0 : i32, i32, i32
  }
}

</mosaic_0001>

<bundles_post_ra>
// kernel: crf_rnn_forward.1
= control target key start
LH: loop header
LB: loop body
LE: loop exit
PB: predicated region body
PF: predicated region fallthrough
CT: control target
= control target key end

     0   :  { %v1773_v1 = vmov 0   ;;  %v1774_v33 = vmov 1983009808   ;;  %v217_v35 = vlaneseq  ;;  %vm341_vm0 = vcmask 516096   ;;  %s2446_s1 = inlined_call_operand.vmem [shape: bf16[128,512], index: 1, kind: input, shape index: {}]   ;;  %s2447_s0 = inlined_call_operand.vmem [shape: bf16[8,2,512], index: 0, kind: input, shape index: {}]   ;;  %s2448_s2 = inlined_call_operand.vmem [shape: bf16[128,128], index: 2, kind: input, shape index: {}]   ;;  %s2449_s3 = inlined_call_operand.vmem [shape: f32[1,128], index: 3, kind: input, shape index: {}]   ;;  %s2450_s4 = inlined_call_operand.vmem [shape: f32[1,16,128], index: 4, kind: output, shape index: {}]  }
   0x1   :  { %v1805_v0 = vld [vmem:[%s2446_s1 + $0x4] ss:$16 sps:$4 sm:$0xff]   ;;  %266 = vmatprep.mubr.bf16.mxu0 %v1773_v1  ;;  %307 = vmatprep.mubr.bf16.mxu1 %v1773_v1  ;;  %v1812_v2 = vld [vmem:[%s2446_s1] ss:$16 sps:$4 sm:$0xff]   ;;  %v1835_v6 = vld [vmem:[%s2446_s1 + $0xc] ss:$16 sps:$4 sm:$0xff]   ;;  %v215_v34 = vunpack.c.l.s4 %v1774_v33 }
   0x2   :  { %234 = vmatprep.subr.bf16.mxu0 %v1805_v0  ;;  %v1818_v3 = vld [vmem:[%s2446_s1 + $0x24] ss:$16 sps:$4 sm:$0xff]   ;;  %v1824_v4 = vld [vmem:[%s2446_s1 + $0x20] ss:$16 sps:$4 sm:$0xff]   ;;  %v1840_v7 = vld [vmem:[%s2446_s1 + $0x8] ss:$16 sps:$4 sm:$0xff]   ;;  %275 = vmatprep.subr.bf16.mxu1 %v1835_v6 }
   0x3   :  { %235 = vmatpush1.bf16.msra.mxu0 %v1812_v2  ;;  %v1830_v5 = vld [vmem:[%s2446_s1 + $0x44] ss:$16 sps:$4 sm:$0xff]   ;;  %v1846_v8 = vld [vmem:[%s2446_s1 + $0x40] ss:$16 sps:$4 sm:$0xff]   ;;  %276 = vmatpush1.bf16.msra.mxu1 %v1840_v7  ;;  %v1859_v10 = vld [vmem:[%s2446_s1 + $0x2c] ss:$16 sps:$4 sm:$0xff]   ;;  %v216_v36 = vunpack.c.0.s8 %v215_v34 }
   0x4   :  { %236 = vmatprep.subr.bf16.mxu0 %v1818_v3  ;;  %v1853_v9 = vld [vmem:[%s2446_s1 + $0x64] ss:$16 sps:$4 sm:$0xff]   ;;  %v1864_v11 = vld [vmem:[%s2446_s1 + $0x28] ss:$16 sps:$4 sm:$0xff]   ;;  %277 = vmatprep.subr.bf16.mxu1 %v1859_v10  ;;  %v1871_v12 = vld [vmem:[%s2446_s1 + $0x60] ss:$16 sps:$4 sm:$0xff]  }
   0x5   :  { %v1876_v13 = vld [vmem:[%s2446_s1 + $0x84] ss:$16 sps:$4 sm:$0xff]   ;;  %v1881_v14 = vld [vmem:[%s2446_s1 + $0x4c] ss:$16 sps:$4 sm:$0xff]   ;;  %v1888_v15 = vld [vmem:[%s2446_s1 + $0x48] ss:$16 sps:$4 sm:$0xff]  }
   0x6   :  { %v1894_v16 = vld [vmem:[%s2446_s1 + $0x6c] ss:$16 sps:$4 sm:$0xff]   ;;  %v1900_v17 = vld [vmem:[%s2446_s1 + $0x80] ss:$16 sps:$4 sm:$0xff]   ;;  %v1906_v18 = vld [vmem:[%s2446_s1 + $0xa4] ss:$16 sps:$4 sm:$0xff]  }
   0x7   :  { %237 = vmatpush1.bf16.msra.mxu0 %v1824_v4  ;;  %278 = vmatpush1.bf16.msra.mxu1 %v1864_v11  ;;  %v1912_v19 = vld [vmem:[%s2446_s1 + $0x68] ss:$16 sps:$4 sm:$0xff]   ;;  %v1918_v20 = vld [vmem:[%s2446_s1 + $0x8c] ss:$16 sps:$4 sm:$0xff]   ;;  %v1924_v21 = vld [vmem:[%s2446_s1 + $0xa0] ss:$16 sps:$4 sm:$0xff]  }
   0x8   :  { %238 = vmatprep.subr.bf16.mxu0 %v1830_v5  ;;  %279 = vmatprep.subr.bf16.mxu1 %v1881_v14  ;;  %v1929_v22 = vld [vmem:[%s2446_s1 + $0xc4] ss:$16 sps:$4 sm:$0xff]   ;;  %v1936_v23 = vld [vmem:[%s2446_s1 + $0x88] ss:$16 sps:$4 sm:$0xff]   ;;  %v1942_v24 = vld [vmem:[%s2446_s1 + $0xac] ss:$16 sps:$4 sm:$0xff]  }
   0x9   :  { %v1948_v25 = vld [vmem:[%s2446_s1 + $0xc0] ss:$16 sps:$4 sm:$0xff]   ;;  %v1954_v26 = vld [vmem:[%s2446_s1 + $0xe4] ss:$16 sps:$4 sm:$0xff]   ;;  %v1960_v27 = vld [vmem:[%s2446_s1 + $0xa8] ss:$16 sps:$4 sm:$0xff]  }
   0xa   :  { %v1966_v28 = vld [vmem:[%s2446_s1 + $0xcc] ss:$16 sps:$4 sm:$0xff]   ;;  %v1972_v29 = vld [vmem:[%s2446_s1 + $0xe0] ss:$16 sps:$4 sm:$0xff]   ;;  %v1979_v30 = vld [vmem:[%s2446_s1 + $0xc8] ss:$16 sps:$4 sm:$0xff]  }
   0xb   :  { %239 = vmatpush1.bf16.msra.mxu0 %v1846_v8  ;;  %280 = vmatpush1.bf16.msra.mxu1 %v1888_v15  ;;  %v1985_v31 = vld [vmem:[%s2446_s1 + $0xec] ss:$16 sps:$4 sm:$0xff]   ;;  %v1992_v32 = vld [vmem:[%s2446_s1 + $0xe8] ss:$16 sps:$4 sm:$0xff]   ;;  %v218_v37 = vshrl.u32 %v217_v35, 7  ;;  %v2037_v38 = vld [vmem:[%s2447_s0] sm:$0xff]  }
   0xc   :  { %240 = vmatprep.subr.bf16.mxu0 %v1853_v9  ;;  %281 = vmatprep.subr.bf16.mxu1 %v1894_v16  ;;  %v51_v39 = vunpack.c.l.bf16 %v2037_v38  ;;  %vm346_vm1 = vcmask 1048071   ;;  %vm483_vm2 = vcmask 517121   ;;  %vm487_vm3 = vcmask 1047046  }
   0xd   :  { %v2040_v40 = vsub.s32 %v216_v36, %v218_v37  ;;  %vm624_vm4 = vcmask 518146   ;;  %vm628_vm5 = vcmask 1046021   ;;  %vm765_vm6 = vcmask 519171  }
   0xe   :  { %v213_v42 = vcombine.high %v51_v39, %v51_v39  ;;  %vm769_vm7 = vcmask 1044996   ;;  %vm906_vm8 = vcmask 520196   ;;  %vm910_vm9 = vcmask 1043971  }
   0xf   :  { %241 = vmatpush1.bf16.msra.mxu0 %v1871_v12  ;;  %282 = vmatpush1.bf16.msra.mxu1 %v1912_v19  ;;  %v220_v41 = vrot.slane %v51_v39, %v2040_v40  ;;  %vm1047_vm10 = vcmask 521221   ;;  %vm1051_vm11 = vcmask 1042946   ;;  %vm1188_vm12 = vcmask 522246  }
  0x10   :  { %242 = vmatprep.subr.bf16.mxu0 %v1876_v13  ;;  %283 = vmatprep.subr.bf16.mxu1 %v1918_v20  ;;  %v227_v44 = vrot.slane %v213_v42, %v2040_v40  ;;  %vm1192_vm13 = vcmask 1041921   ;;  %vm1776_vm14 = vmmov 0   ;;  %vm1331_vm15 = vcmask 1040896  }
  0x11   :  { %v228_v43 = vcombine.high %v220_v41, %v220_v41 }
  0x12   :  { %v229_v52 = vcombine.high %v227_v44, %v227_v44 }
  0x13   :  { %243 = vmatpush1.bf16.msra.mxu0 %v1900_v17  ;;  %284 = vmatpush1.bf16.msra.mxu1 %v1936_v23 }
  0x14   :  { %244 = vmatprep.subr.bf16.mxu0 %v1906_v18  ;;  %285 = vmatprep.subr.bf16.mxu1 %v1942_v24 }
  0x17   :  { %245 = vmatpush1.bf16.msra.mxu0 %v1924_v21  ;;  %286 = vmatpush1.bf16.msra.mxu1 %v1960_v27 }
  0x18   :  { %246 = vmatprep.subr.bf16.mxu0 %v1929_v22  ;;  %287 = vmatprep.subr.bf16.mxu1 %v1966_v28 }
  0x1b   :  { %247 = vmatpush1.bf16.msra.mxu0 %v1948_v25  ;;  %288 = vmatpush1.bf16.msra.mxu1 %v1979_v30 }
  0x1c   :  { %248 = vmatprep.subr.bf16.mxu0 %v1954_v26  ;;  %289 = vmatprep.subr.bf16.mxu1 %v1985_v31 }
  0x1f   :  { %249 = vmatpush1.bf16.msra.mxu0 %v1972_v29  ;;  %290 = vmatpush1.bf16.msra.mxu1 %v1992_v32 }
  0x20   :  { %373 = vmatprep.subr.bf16.mxu0 %v1805_v0  ;;  %414 = vmatprep.subr.bf16.mxu1 %v1835_v6 }
  0x22   :  { %267 = vmatmul.mubr.bf16.vlgmr.msra.gmra.mrb[0].mxu0 %v1773_v1  ;;  %308 = vmatmul.mubr.bf16.vlgmr.msra.gmra.mrb[0].mxu1 %v1773_v1 }
  0x23   :  { %374 = vmatpush1.bf16.msra.mxu0 %v1812_v2  ;;  %405 = vmatprep.mubr.bf16.mxu0 %v1773_v1 }
  0x24   :  { %375 = vmatprep.subr.bf16.mxu0 %v1818_v3  ;;  %415 = vmatpush1.bf16.msra.mxu1 %v1840_v7 }
  0x25   :  { %416 = vmatprep.subr.bf16.mxu1 %v1859_v10  ;;  %446 = vmatprep.mubr.bf16.mxu1 %v1773_v1 }
  0x27   :  { %376 = vmatpush1.bf16.msra.mxu0 %v1824_v4 }
  0x28   :  { %377 = vmatprep.subr.bf16.mxu0 %v1830_v5  ;;  %417 = vmatpush1.bf16.msra.mxu1 %v1864_v11 }
  0x29   :  { %418 = vmatprep.subr.bf16.mxu1 %v1881_v14 }
  0x2b   :  { %378 = vmatpush1.bf16.msra.mxu0 %v1846_v8 }
  0x2c   :  { %379 = vmatprep.subr.bf16.mxu0 %v1853_v9  ;;  %419 = vmatpush1.bf16.msra.mxu1 %v1888_v15 }
  0x2d   :  { %420 = vmatprep.subr.bf16.mxu1 %v1894_v16 }
  0x2f   :  { %380 = vmatpush1.bf16.msra.mxu0 %v1871_v12 }
  0x30   :  { %381 = vmatprep.subr.bf16.mxu0 %v1876_v13  ;;  %421 = vmatpush1.bf16.msra.mxu1 %v1912_v19 }
  0x31   :  { %422 = vmatprep.subr.bf16.mxu1 %v1918_v20 }
  0x33   :  { %382 = vmatpush1.bf16.msra.mxu0 %v1900_v17 }
  0x34   :  { %383 = vmatprep.subr.bf16.mxu0 %v1906_v18  ;;  %423 = vmatpush1.bf16.msra.mxu1 %v1936_v23 }
  0x35   :  { %424 = vmatprep.subr.bf16.mxu1 %v1942_v24 }
  0x37   :  { %384 = vmatpush1.bf16.msra.mxu0 %v1924_v21 }
  0x38   :  { %385 = vmatprep.subr.bf16.mxu0 %v1929_v22  ;;  %425 = vmatpush1.bf16.msra.mxu1 %v1960_v27 }
  0x39   :  { %426 = vmatprep.subr.bf16.mxu1 %v1966_v28 }
  0x3b   :  { %386 = vmatpush1.bf16.msra.mxu0 %v1948_v25 }
  0x3c   :  { %387 = vmatprep.subr.bf16.mxu0 %v1954_v26  ;;  %427 = vmatpush1.bf16.msra.mxu1 %v1979_v30 }
  0x3d   :  { %428 = vmatprep.subr.bf16.mxu1 %v1985_v31 }
  0x3f   :  { %388 = vmatpush1.bf16.msra.mxu0 %v1972_v29 }
  0x40   :  { %514 = vmatprep.subr.bf16.mxu0 %v1805_v0  ;;  %429 = vmatpush1.bf16.msra.mxu1 %v1992_v32 }
  0x41   :  { %555 = vmatprep.subr.bf16.mxu1 %v1835_v6 }
  0xf5   :  { %v268_v45 = vpop.f32.mrb[0].mxu0  ;;  %v309_v54 = vpop.f32.mrb[0].mxu1 }
  0xf6   :  { %v269_v46 = vadd.f32 %v268_v45, %v220_v41  ;;  %v270_v47 = vpop.f32.mrb[1].mxu0  ;;  %v311_v55 = vpop.f32.mrb[1].mxu1  ;;  %v310_v60 = vadd.f32 %v309_v54, %v227_v44 }
  0xf7   :  { %v271_v48 = vadd.f32 %v270_v47, %v228_v43  ;;  %v272_v49 = vpop.f32.mrb[2].mxu0  ;;  %v312_v56 = vadd.f32 %v311_v55, %v229_v52  ;;  %v313_v57 = vpop.f32.mrb[2].mxu1 }
  0xf8   :  { %v1484_v50 = vmul.f32 -1.442695, %v269_v46  ;;  %v273_v51 = vpop.f32.mrb[3].mxu0  ;;  %v314_v58 = vpop.f32.mrb[3].mxu1  ;;  %v350_v49 = vunpack.c.h.bf16 %v2037_v38 }
  0xf9   :  { %v1485_v53 = vmul.f32 -1.442695, %v271_v48  ;;  %v1486_v59 = vmul.f32 -1.442695, %v312_v56 }
  0xfa   :  { %1613 = vpow2.f32 %v1484_v50  ;;  %v359_v50 = vrot.slane %v350_v49, %v2040_v40  ;;  %v352_v51 = vcombine.high %v350_v49, %v350_v49 }
  0xfb   :  { %1615 = vpow2.f32 %v1485_v53 }
  0xfc   :  { %1617 = vpow2.f32 %v1486_v59  ;;  %v367_v52 = vcombine.high %v359_v50, %v359_v50  ;;  %v366_v54 = vrot.slane %v352_v51, %v2040_v40 }
  0xfd   :  { %1619 = vtanh.f32 %v310_v60 }
 0x104   :  { %v1614_v61 = vpop.eup %1613 }
 0x105   :  { %v1616_v62 = vpop.eup %1615  ;;  %v319_v63 = vadd.f32 1.0, %v1614_v61 }
 0x106   :  { %v325_v33 = vadd.f32 1.0, %v1616_v62  ;;  %v1618_v34 = vpop.eup %1617 }
 0x107   :  { %1621 = vrcp.f32 %v319_v63  ;;  %v1620_v35 = vpop.eup %1619  ;;  %v332_v37 = vadd.f32 1.0, %v1618_v34 }
 0x108   :  { %1623 = vrcp.f32 %v325_v33 }
 0x109   :  { %1625 = vrcp.f32 %v332_v37 }
 0x111   :  { %v1622_v36 = vpop.eup %1621 }
 0x112   :  { %v1624_v39 = vpop.eup %1623  ;;  %v336_v41 = vmul.f32 %v1622_v36, %v1620_v35  ;;  %v368_v35 = vcombine.high %v366_v54, %v366_v54 }
 0x113   :  { %v335_v42 = vmul.f32 0.0, %v1624_v39  ;;  %v1626_v44 = vpop.eup %1625 }
 0x115   :  { %v2044_v43 = vadd.f32 %v336_v41, %v335_v42 }
 0x117   :  { %1627 = vtanh.f32 %v2044_v43 }
 0x121   :  { %v1628_v45 = vpop.eup %1627 }
 0x122   :  { %v339_v46 = vmul.f32 %v1628_v45, %v1626_v44 }
 0x124   :  { %v340_v47 = vpack.c.bf16 %v339_v46, %v339_v46 }
 0x126   :  { %342 = vst.msk [vmem:[#allocation2] sm:$0x1] %vm341_vm0, %v340_v47  ;;  %v344_v48 = vrot.slane %v340_v47, 1  ;;  %406 = vmatmul.mubr.bf16.vlgmr.msra.gmra.mrb[4].mxu0 %v340_v47  ;;  %447 = vmatmul.mubr.bf16.vlgmr.msra.gmra.mrb[4].mxu1 %v340_v47  ;;  %vm1329_vm0 = vcmask 523271  }
 0x127   :  { %515 = vmatpush1.bf16.msra.mxu0 %v1812_v2  ;;  %556 = vmatpush1.bf16.msra.mxu1 %v1840_v7 }
 0x128   :  { %347 = vst.msk [vmem:[#allocation2] sm:$0x80] %vm346_vm1, %v344_v48  ;;  %516 = vmatprep.subr.bf16.mxu0 %v1818_v3  ;;  %557 = vmatprep.subr.bf16.mxu1 %v1859_v10 }
 0x129   :  { %546 = vmatprep.mubr.bf16.mxu0 %v1773_v1  ;;  %587 = vmatprep.mubr.bf16.mxu1 %v1773_v1 }
 0x12b   :  { %517 = vmatpush1.bf16.msra.mxu0 %v1824_v4  ;;  %558 = vmatpush1.bf16.msra.mxu1 %v1864_v11 }
 0x12c   :  { %518 = vmatprep.subr.bf16.mxu0 %v1830_v5  ;;  %559 = vmatprep.subr.bf16.mxu1 %v1881_v14 }
 0x12f   :  { %519 = vmatpush1.bf16.msra.mxu0 %v1846_v8  ;;  %560 = vmatpush1.bf16.msra.mxu1 %v1888_v15 }
 0x130   :  { %520 = vmatprep.subr.bf16.mxu0 %v1853_v9  ;;  %561 = vmatprep.subr.bf16.mxu1 %v1894_v16 }
 0x133   :  { %521 = vmatpush1.bf16.msra.mxu0 %v1871_v12  ;;  %562 = vmatpush1.bf16.msra.mxu1 %v1912_v19 }
 0x134   :  { %522 = vmatprep.subr.bf16.mxu0 %v1876_v13  ;;  %563 = vmatprep.subr.bf16.mxu1 %v1918_v20 }
 0x137   :  { %523 = vmatpush1.bf16.msra.mxu0 %v1900_v17  ;;  %564 = vmatpush1.bf16.msra.mxu1 %v1936_v23 }
 0x138   :  { %524 = vmatprep.subr.bf16.mxu0 %v1906_v18  ;;  %565 = vmatprep.subr.bf16.mxu1 %v1942_v24 }
 0x13b   :  { %525 = vmatpush1.bf16.msra.mxu0 %v1924_v21  ;;  %566 = vmatpush1.bf16.msra.mxu1 %v1960_v27 }
 0x13c   :  { %526 = vmatprep.subr.bf16.mxu0 %v1929_v22  ;;  %567 = vmatprep.subr.bf16.mxu1 %v1966_v28 }
 0x13f   :  { %527 = vmatpush1.bf16.msra.mxu0 %v1948_v25  ;;  %568 = vmatpush1.bf16.msra.mxu1 %v1979_v30 }
 0x140   :  { %528 = vmatprep.subr.bf16.mxu0 %v1954_v26  ;;  %569 = vmatprep.subr.bf16.mxu1 %v1985_v31 }
 0x143   :  { %529 = vmatpush1.bf16.msra.mxu0 %v1972_v29  ;;  %570 = vmatpush1.bf16.msra.mxu1 %v1992_v32 }
 0x144   :  { %655 = vmatprep.subr.bf16.mxu0 %v1805_v0  ;;  %696 = vmatprep.subr.bf16.mxu1 %v1835_v6 }
 0x1f9   :  { %v407_v53 = vpop.f32.mrb[4].mxu0  ;;  %v448_v55 = vpop.f32.mrb[4].mxu1 }
 0x1fa   :  { %v408_v56 = vadd.f32 %v407_v53, %v359_v50  ;;  %v409_v57 = vpop.f32.mrb[5].mxu0  ;;  %v450_v58 = vpop.f32.mrb[5].mxu1  ;;  %v449_v37 = vadd.f32 %v448_v55, %v366_v54 }
 0x1fb   :  { %v410_v59 = vadd.f32 %v409_v57, %v367_v52  ;;  %v411_v60 = vpop.f32.mrb[6].mxu0  ;;  %v452_v61 = vpop.f32.mrb[6].mxu1  ;;  %v451_v38 = vadd.f32 %v450_v58, %v368_v35 }
 0x1fc   :  { %v1488_v62 = vmul.f32 -1.442695, %v408_v56  ;;  %v412_v63 = vpop.f32.mrb[7].mxu0  ;;  %v453_v33 = vpop.f32.mrb[7].mxu1 }
 0x1fd   :  { %v1489_v34 = vmul.f32 -1.442695, %v410_v59  ;;  %v1490_v36 = vmul.f32 -1.442695, %v451_v38 }
 0x1fe   :  { %1629 = vpow2.f32 %v1488_v62 }
 0x1ff   :  { %1631 = vpow2.f32 %v1489_v34 }
 0x200   :  { %1633 = vpow2.f32 %v1490_v36 }
 0x201   :  { %1635 = vtanh.f32 %v449_v37 }
 0x208   :  { %v1630_v39 = vpop.eup %1629 }
 0x209   :  { %v1632_v41 = vpop.eup %1631  ;;  %v458_v42 = vadd.f32 1.0, %v1630_v39 }
 0x20a   :  { %v464_v44 = vadd.f32 1.0, %v1632_v41  ;;  %v1634_v45 = vpop.eup %1633 }
 0x20b   :  { %1637 = vrcp.f32 %v458_v42  ;;  %v1636_v46 = vpop.eup %1635  ;;  %v471_v50 = vadd.f32 1.0, %v1634_v45 }
 0x20c   :  { %1639 = vrcp.f32 %v464_v44 }
 0x20d   :  { %1641 = vrcp.f32 %v471_v50 }
 0x215   :  { %v1638_v47 = vpop.eup %1637 }
 0x216   :  { %v1640_v48 = vpop.eup %1639  ;;  %v475_v49 = vmul.f32 %v1638_v47, %v1636_v46 }
 0x217   :  { %v474_v51 = vmul.f32 %v1640_v48, %v2044_v43  ;;  %v1642_v53 = vpop.eup %1641  ;;  %v2125_v43 = vld [vmem:[%s2447_s0 + $0x8] sm:$0xff]  }
 0x218   :  { %v491_v59 = vunpack.c.l.bf16 %v2125_v43 }
 0x219   :  { %v2085_v52 = vadd.f32 %v475_v49, %v474_v51 }
 0x21a   :  { %v500_v60 = vrot.slane %v491_v59, %v2040_v40  ;;  %v493_v61 = vcombine.high %v491_v59, %v491_v59 }
 0x21b   :  { %1643 = vtanh.f32 %v2085_v52 }
 0x21c   :  { %v508_v62 = vcombine.high %v500_v60, %v500_v60  ;;  %v507_v33 = vrot.slane %v493_v61, %v2040_v40 }
 0x21e   :  { %v509_v47 = vcombine.high %v507_v33, %v507_v33 }
 0x225   :  { %v1644_v54 = vpop.eup %1643 }
 0x226   :  { %v478_v55 = vmul.f32 %v1644_v54, %v1642_v53 }
 0x228   :  { %v479_v56 = vpack.c.bf16 %v478_v55, %v478_v55 }
 0x22a   :  { %v481_v57 = vrot.slane %v479_v56, 7  ;;  %v485_v58 = vrot.slane %v479_v56, 2  ;;  %547 = vmatmul.mubr.bf16.vlgmr.msra.gmra.mrb[8].mxu0 %v479_v56  ;;  %588 = vmatmul.mubr.bf16.vlgmr.msra.gmra.mrb[8].mxu1 %v479_v56 }
 0x22b   :  { %656 = vmatpush1.bf16.msra.mxu0 %v1812_v2  ;;  %697 = vmatpush1.bf16.msra.mxu1 %v1840_v7 }
 0x22c   :  { %484 = vst.msk [vmem:[#allocation2] sm:$0x2] %vm483_vm2, %v481_v57  ;;  %657 = vmatprep.subr.bf16.mxu0 %v1818_v3  ;;  %698 = vmatprep.subr.bf16.mxu1 %v1859_v10 }
 0x22d   :  { %488 = vst.msk [vmem:[#allocation2] sm:$0x40] %vm487_vm3, %v485_v58  ;;  %687 = vmatprep.mubr.bf16.mxu0 %v1773_v1  ;;  %728 = vmatprep.mubr.bf16.mxu1 %v1773_v1 }
 0x22f   :  { %658 = vmatpush1.bf16.msra.mxu0 %v1824_v4  ;;  %699 = vmatpush1.bf16.msra.mxu1 %v1864_v11 }
 0x230   :  { %659 = vmatprep.subr.bf16.mxu0 %v1830_v5  ;;  %700 = vmatprep.subr.bf16.mxu1 %v1881_v14 }
 0x233   :  { %660 = vmatpush1.bf16.msra.mxu0 %v1846_v8  ;;  %701 = vmatpush1.bf16.msra.mxu1 %v1888_v15 }
 0x234   :  { %661 = vmatprep.subr.bf16.mxu0 %v1853_v9  ;;  %702 = vmatprep.subr.bf16.mxu1 %v1894_v16 }
 0x237   :  { %662 = vmatpush1.bf16.msra.mxu0 %v1871_v12  ;;  %703 = vmatpush1.bf16.msra.mxu1 %v1912_v19 }
 0x238   :  { %663 = vmatprep.subr.bf16.mxu0 %v1876_v13  ;;  %704 = vmatprep.subr.bf16.mxu1 %v1918_v20 }
 0x23b   :  { %664 = vmatpush1.bf16.msra.mxu0 %v1900_v17  ;;  %705 = vmatpush1.bf16.msra.mxu1 %v1936_v23 }
 0x23c   :  { %665 = vmatprep.subr.bf16.mxu0 %v1906_v18  ;;  %706 = vmatprep.subr.bf16.mxu1 %v1942_v24 }
 0x23f   :  { %666 = vmatpush1.bf16.msra.mxu0 %v1924_v21  ;;  %707 = vmatpush1.bf16.msra.mxu1 %v1960_v27 }
 0x240   :  { %667 = vmatprep.subr.bf16.mxu0 %v1929_v22  ;;  %708 = vmatprep.subr.bf16.mxu1 %v1966_v28 }
 0x243   :  { %668 = vmatpush1.bf16.msra.mxu0 %v1948_v25  ;;  %709 = vmatpush1.bf16.msra.mxu1 %v1979_v30 }
 0x244   :  { %669 = vmatprep.subr.bf16.mxu0 %v1954_v26  ;;  %710 = vmatprep.subr.bf16.mxu1 %v1985_v31 }
 0x247   :  { %670 = vmatpush1.bf16.msra.mxu0 %v1972_v29  ;;  %711 = vmatpush1.bf16.msra.mxu1 %v1992_v32 }
 0x248   :  { %796 = vmatprep.subr.bf16.mxu0 %v1805_v0  ;;  %837 = vmatprep.subr.bf16.mxu1 %v1835_v6 }
 0x2fd   :  { %v548_v63 = vpop.f32.mrb[8].mxu0  ;;  %v589_v34 = vpop.f32.mrb[8].mxu1 }
 0x2fe   :  { %v549_v35 = vadd.f32 %v548_v63, %v500_v60  ;;  %v550_v38 = vpop.f32.mrb[9].mxu0  ;;  %v591_v36 = vpop.f32.mrb[9].mxu1  ;;  %v590_v50 = vadd.f32 %v589_v34, %v507_v33 }
 0x2ff   :  { %v551_v37 = vadd.f32 %v550_v38, %v508_v62  ;;  %v552_v39 = vpop.f32.mrb[10].mxu0  ;;  %v593_v41 = vpop.f32.mrb[10].mxu1  ;;  %v592_v48 = vadd.f32 %v591_v36, %v509_v47 }
 0x300   :  { %v1492_v42 = vmul.f32 -1.442695, %v549_v35  ;;  %v553_v44 = vpop.f32.mrb[11].mxu0  ;;  %v594_v45 = vpop.f32.mrb[11].mxu1 }
 0x301   :  { %v1493_v46 = vmul.f32 -1.442695, %v551_v37  ;;  %v1494_v49 = vmul.f32 -1.442695, %v592_v48 }
 0x302   :  { %1645 = vpow2.f32 %v1492_v42 }
 0x303   :  { %1647 = vpow2.f32 %v1493_v46 }
 0x304   :  { %1649 = vpow2.f32 %v1494_v49 }
 0x305   :  { %1651 = vtanh.f32 %v590_v50 }
 0x30c   :  { %v1646_v51 = vpop.eup %1645 }
 0x30d   :  { %v1648_v53 = vpop.eup %1647  ;;  %v599_v54 = vadd.f32 1.0, %v1646_v51 }
 0x30e   :  { %v605_v55 = vadd.f32 1.0, %v1648_v53  ;;  %v1650_v56 = vpop.eup %1649 }
 0x30f   :  { %1653 = vrcp.f32 %v599_v54  ;;  %v1652_v57 = vpop.eup %1651  ;;  %v612_v61 = vadd.f32 1.0, %v1650_v56 }
 0x310   :  { %1655 = vrcp.f32 %v605_v55 }
 0x311   :  { %1657 = vrcp.f32 %v612_v61 }
 0x319   :  { %v1654_v58 = vpop.eup %1653 }
 0x31a   :  { %v1656_v59 = vpop.eup %1655  ;;  %v616_v60 = vmul.f32 %v1654_v58, %v1652_v57 }
 0x31b   :  { %v615_v62 = vmul.f32 %v1656_v59, %v2085_v52  ;;  %v1658_v33 = vpop.eup %1657  ;;  %v632_v52 = vunpack.c.h.bf16 %v2125_v43 }
 0x31d   :  { %v2131_v63 = vadd.f32 %v616_v60, %v615_v62  ;;  %v641_v39 = vrot.slane %v632_v52, %v2040_v40  ;;  %v634_v41 = vcombine.high %v632_v52, %v632_v52 }
 0x31f   :  { %1659 = vtanh.f32 %v2131_v63  ;;  %v649_v42 = vcombine.high %v641_v39, %v641_v39  ;;  %v648_v45 = vrot.slane %v634_v41, %v2040_v40 }
 0x321   :  { %v650_v58 = vcombine.high %v648_v45, %v648_v45 }
 0x329   :  { %v1660_v34 = vpop.eup %1659 }
 0x32a   :  { %v619_v35 = vmul.f32 %v1660_v34, %v1658_v33 }
 0x32c   :  { %v620_v38 = vpack.c.bf16 %v619_v35, %v619_v35 }
 0x32e   :  { %v622_v36 = vrot.slane %v620_v38, 6  ;;  %v626_v37 = vrot.slane %v620_v38, 3  ;;  %688 = vmatmul.mubr.bf16.vlgmr.msra.gmra.mrb[12].mxu0 %v620_v38  ;;  %729 = vmatmul.mubr.bf16.vlgmr.msra.gmra.mrb[12].mxu1 %v620_v38 }
 0x32f   :  { %797 = vmatpush1.bf16.msra.mxu0 %v1812_v2  ;;  %838 = vmatpush1.bf16.msra.mxu1 %v1840_v7 }
 0x330   :  { %625 = vst.msk [vmem:[#allocation2] sm:$0x4] %vm624_vm4, %v622_v36  ;;  %798 = vmatprep.subr.bf16.mxu0 %v1818_v3  ;;  %839 = vmatprep.subr.bf16.mxu1 %v1859_v10 }
 0x331   :  { %629 = vst.msk [vmem:[#allocation2] sm:$0x20] %vm628_vm5, %v626_v37  ;;  %828 = vmatprep.mubr.bf16.mxu0 %v1773_v1  ;;  %869 = vmatprep.mubr.bf16.mxu1 %v1773_v1 }
 0x333   :  { %799 = vmatpush1.bf16.msra.mxu0 %v1824_v4  ;;  %840 = vmatpush1.bf16.msra.mxu1 %v1864_v11 }
 0x334   :  { %800 = vmatprep.subr.bf16.mxu0 %v1830_v5  ;;  %841 = vmatprep.subr.bf16.mxu1 %v1881_v14 }
 0x337   :  { %801 = vmatpush1.bf16.msra.mxu0 %v1846_v8  ;;  %842 = vmatpush1.bf16.msra.mxu1 %v1888_v15 }
 0x338   :  { %802 = vmatprep.subr.bf16.mxu0 %v1853_v9  ;;  %843 = vmatprep.subr.bf16.mxu1 %v1894_v16 }
 0x33b   :  { %803 = vmatpush1.bf16.msra.mxu0 %v1871_v12  ;;  %844 = vmatpush1.bf16.msra.mxu1 %v1912_v19 }
 0x33c   :  { %804 = vmatprep.subr.bf16.mxu0 %v1876_v13  ;;  %845 = vmatprep.subr.bf16.mxu1 %v1918_v20 }
 0x33f   :  { %805 = vmatpush1.bf16.msra.mxu0 %v1900_v17  ;;  %846 = vmatpush1.bf16.msra.mxu1 %v1936_v23 }
 0x340   :  { %806 = vmatprep.subr.bf16.mxu0 %v1906_v18  ;;  %847 = vmatprep.subr.bf16.mxu1 %v1942_v24 }
 0x343   :  { %807 = vmatpush1.bf16.msra.mxu0 %v1924_v21  ;;  %848 = vmatpush1.bf16.msra.mxu1 %v1960_v27 }
 0x344   :  { %808 = vmatprep.subr.bf16.mxu0 %v1929_v22  ;;  %849 = vmatprep.subr.bf16.mxu1 %v1966_v28 }
 0x347   :  { %809 = vmatpush1.bf16.msra.mxu0 %v1948_v25  ;;  %850 = vmatpush1.bf16.msra.mxu1 %v1979_v30 }
 0x348   :  { %810 = vmatprep.subr.bf16.mxu0 %v1954_v26  ;;  %851 = vmatprep.subr.bf16.mxu1 %v1985_v31 }
 0x34b   :  { %811 = vmatpush1.bf16.msra.mxu0 %v1972_v29  ;;  %852 = vmatpush1.bf16.msra.mxu1 %v1992_v32 }
 0x34c   :  { %937 = vmatprep.subr.bf16.mxu0 %v1805_v0  ;;  %978 = vmatprep.subr.bf16.mxu1 %v1835_v6 }
 0x401   :  { %v689_v44 = vpop.f32.mrb[12].mxu0  ;;  %v730_v46 = vpop.f32.mrb[12].mxu1 }
 0x402   :  { %v690_v47 = vadd.f32 %v689_v44, %v641_v39  ;;  %v691_v48 = vpop.f32.mrb[13].mxu0  ;;  %v732_v49 = vpop.f32.mrb[13].mxu1  ;;  %v731_v60 = vadd.f32 %v730_v46, %v648_v45 }
 0x403   :  { %v692_v50 = vadd.f32 %v691_v48, %v649_v42  ;;  %v693_v51 = vpop.f32.mrb[14].mxu0  ;;  %v734_v53 = vpop.f32.mrb[14].mxu1  ;;  %v733_v43 = vadd.f32 %v732_v49, %v650_v58 }
 0x404   :  { %v1496_v54 = vmul.f32 -1.442695, %v690_v47  ;;  %v694_v55 = vpop.f32.mrb[15].mxu0  ;;  %v735_v56 = vpop.f32.mrb[15].mxu1 }
 0x405   :  { %v1497_v57 = vmul.f32 -1.442695, %v692_v50  ;;  %v1498_v59 = vmul.f32 -1.442695, %v733_v43 }
 0x406   :  { %1661 = vpow2.f32 %v1496_v54 }
 0x407   :  { %1663 = vpow2.f32 %v1497_v57 }
 0x408   :  { %1665 = vpow2.f32 %v1498_v59 }
 0x409   :  { %1667 = vtanh.f32 %v731_v60 }
 0x410   :  { %v1662_v61 = vpop.eup %1661 }
 0x411   :  { %v1664_v62 = vpop.eup %1663  ;;  %v740_v33 = vadd.f32 1.0, %v1662_v61 }
 0x412   :  { %v746_v34 = vadd.f32 1.0, %v1664_v62  ;;  %v1666_v35 = vpop.eup %1665 }
 0x413   :  { %1669 = vrcp.f32 %v740_v33  ;;  %v1668_v38 = vpop.eup %1667  ;;  %v753_v39 = vadd.f32 1.0, %v1666_v35 }
 0x414   :  { %1671 = vrcp.f32 %v746_v34 }
 0x415   :  { %1673 = vrcp.f32 %v753_v39 }
 0x41d   :  { %v1670_v36 = vpop.eup %1669 }
 0x41e   :  { %v1672_v37 = vpop.eup %1671  ;;  %v757_v52 = vmul.f32 %v1670_v36, %v1668_v38 }
 0x41f   :  { %v756_v41 = vmul.f32 %v1672_v37, %v2131_v63  ;;  %v1674_v44 = vpop.eup %1673 }
 0x421   :  { %v2172_v42 = vadd.f32 %v757_v52, %v756_v41 }
 0x423   :  { %1675 = vtanh.f32 %v2172_v42 }
 0x42d   :  { %v1676_v45 = vpop.eup %1675 }
 0x42e   :  { %v760_v46 = vmul.f32 %v1676_v45, %v1674_v44 }
 0x430   :  { %v761_v47 = vpack.c.bf16 %v760_v46, %v760_v46  ;;  %v2224_v46 = vld [vmem:[%s2446_s1] ss:$16 sps:$4 sm:$0xff]  }
 0x432   :  { %v763_v48 = vrot.slane %v761_v47, 5  ;;  %v767_v49 = vrot.slane %v761_v47, 4  ;;  %829 = vmatmul.mubr.bf16.vlgmr.msra.gmra.mrb[16].mxu0 %v761_v47  ;;  %870 = vmatmul.mubr.bf16.vlgmr.msra.gmra.mrb[16].mxu1 %v761_v47  ;;  %v2236_v47 = vld [vmem:[%s2446_s1 + $0x24] ss:$16 sps:$4 sm:$0xff]  }
 0x433   :  { %938 = vmatpush1.bf16.msra.mxu0 %v1812_v2  ;;  %979 = vmatpush1.bf16.msra.mxu1 %v1840_v7  ;;  %v2212_v2 = vld [vmem:[%s2447_s0 + $0x10] sm:$0xff]  }
 0x434   :  { %766 = vst.msk [vmem:[#allocation2] sm:$0x8] %vm765_vm6, %v763_v48  ;;  %939 = vmatprep.subr.bf16.mxu0 %v1818_v3  ;;  %980 = vmatprep.subr.bf16.mxu1 %v1859_v10  ;;  %v773_v3 = vunpack.c.l.bf16 %v2212_v2  ;;  %v2242_v48 = vld [vmem:[%s2446_s1 + $0x2c] ss:$16 sps:$4 sm:$0xff]  }
 0x435   :  { %770 = vst.msk [vmem:[#allocation2] sm:$0x10] %vm769_vm7, %v767_v49  ;;  %969 = vmatprep.mubr.bf16.mxu0 %v1773_v1  ;;  %1010 = vmatprep.mubr.bf16.mxu1 %v1773_v1  ;;  %v2250_v49 = vld [vmem:[%s2446_s1 + $0x20] ss:$16 sps:$4 sm:$0xff]  }
 0x437   :  { %940 = vmatpush1.bf16.msra.mxu0 %v1824_v4  ;;  %981 = vmatpush1.bf16.msra.mxu1 %v1864_v11  ;;  %v782_v4 = vrot.slane %v773_v3, %v2040_v40 }
 0x438   :  { %941 = vmatprep.subr.bf16.mxu0 %v1830_v5  ;;  %982 = vmatprep.subr.bf16.mxu1 %v1881_v14  ;;  %v775_v5 = vcombine.high %v773_v3, %v773_v3  ;;  %v2256_v3 = vld [vmem:[%s2446_s1 + $0x28] ss:$16 sps:$4 sm:$0xff]  }
 0x439   :  { %v790_v7 = vcombine.high %v782_v4, %v782_v4 }
 0x43b   :  { %942 = vmatpush1.bf16.msra.mxu0 %v1846_v8  ;;  %983 = vmatpush1.bf16.msra.mxu1 %v1888_v15 }
 0x43c   :  { %943 = vmatprep.subr.bf16.mxu0 %v1853_v9  ;;  %984 = vmatprep.subr.bf16.mxu1 %v1894_v16  ;;  %v789_v9 = vrot.slane %v775_v5, %v2040_v40  ;;  %v2268_v5 = vld [vmem:[%s2446_s1 + $0x4c] ss:$16 sps:$4 sm:$0xff]  }
 0x43e   :  { %v791_v53 = vcombine.high %v789_v9, %v789_v9 }
 0x43f   :  { %944 = vmatpush1.bf16.msra.mxu0 %v1871_v12  ;;  %985 = vmatpush1.bf16.msra.mxu1 %v1912_v19 }
 0x440   :  { %945 = vmatprep.subr.bf16.mxu0 %v1876_v13  ;;  %986 = vmatprep.subr.bf16.mxu1 %v1918_v20 }
 0x443   :  { %946 = vmatpush1.bf16.msra.mxu0 %v1900_v17  ;;  %987 = vmatpush1.bf16.msra.mxu1 %v1936_v23 }
 0x444   :  { %947 = vmatprep.subr.bf16.mxu0 %v1906_v18  ;;  %988 = vmatprep.subr.bf16.mxu1 %v1942_v24 }
 0x447   :  { %948 = vmatpush1.bf16.msra.mxu0 %v1924_v21  ;;  %989 = vmatpush1.bf16.msra.mxu1 %v1960_v27 }
 0x448   :  { %949 = vmatprep.subr.bf16.mxu0 %v1929_v22  ;;  %990 = vmatprep.subr.bf16.mxu1 %v1966_v28 }
 0x44b   :  { %950 = vmatpush1.bf16.msra.mxu0 %v1948_v25  ;;  %991 = vmatpush1.bf16.msra.mxu1 %v1979_v30 }
 0x44c   :  { %951 = vmatprep.subr.bf16.mxu0 %v1954_v26  ;;  %992 = vmatprep.subr.bf16.mxu1 %v1985_v31 }
 0x44f   :  { %952 = vmatpush1.bf16.msra.mxu0 %v1972_v29  ;;  %993 = vmatpush1.bf16.msra.mxu1 %v1992_v32 }
 0x450   :  { %1078 = vmatprep.subr.bf16.mxu0 %v1805_v0  ;;  %1119 = vmatprep.subr.bf16.mxu1 %v1835_v6 }
 0x505   :  { %v830_v8 = vpop.f32.mrb[16].mxu0  ;;  %v871_v10 = vpop.f32.mrb[16].mxu1 }
 0x506   :  { %v831_v11 = vadd.f32 %v830_v8, %v782_v4  ;;  %v832_v12 = vpop.f32.mrb[17].mxu0  ;;  %v873_v0 = vpop.f32.mrb[17].mxu1  ;;  %v872_v56 = vadd.f32 %v871_v10, %v789_v9  ;;  %v2262_v4 = vld [vmem:[%s2446_s1 + $0x44] ss:$16 sps:$4 sm:$0xff]   ;;  %v2280_v8 = vld [vmem:[%s2446_s1 + $0x48] ss:$16 sps:$4 sm:$0xff]  }
 0x507   :  { %v833_v13 = vadd.f32 %v832_v12, %v790_v7  ;;  %v834_v6 = vpop.f32.mrb[18].mxu0  ;;  %v875_v14 = vpop.f32.mrb[18].mxu1  ;;  %v874_v54 = vadd.f32 %v873_v0, %v791_v53  ;;  %v2274_v7 = vld [vmem:[%s2446_s1 + $0x40] ss:$16 sps:$4 sm:$0xff]   ;;  %v2286_v9 = vld [vmem:[%s2446_s1 + $0x64] ss:$16 sps:$4 sm:$0xff]  }
 0x508   :  { %v1500_v15 = vmul.f32 -1.442695, %v831_v11  ;;  %v835_v63 = vpop.f32.mrb[19].mxu0  ;;  %v876_v50 = vpop.f32.mrb[19].mxu1  ;;  %v2293_v10 = vld [vmem:[%s2446_s1 + $0x60] ss:$16 sps:$4 sm:$0xff]  }
 0x509   :  { %v1501_v51 = vmul.f32 -1.442695, %v833_v13  ;;  %v1502_v55 = vmul.f32 -1.442695, %v874_v54  ;;  %v2300_v11 = vld [vmem:[%s2446_s1 + $0x84] ss:$16 sps:$4 sm:$0xff]  }
 0x50a   :  { %1677 = vpow2.f32 %v1500_v15 }
 0x50b   :  { %1679 = vpow2.f32 %v1501_v51 }
 0x50c   :  { %1681 = vpow2.f32 %v1502_v55 }
 0x50d   :  { %1683 = vtanh.f32 %v872_v56 }
 0x514   :  { %v1678_v57 = vpop.eup %1677 }
 0x515   :  { %v1680_v58 = vpop.eup %1679  ;;  %v881_v43 = vadd.f32 1.0, %v1678_v57 }
 0x516   :  { %v887_v59 = vadd.f32 1.0, %v1680_v58  ;;  %v1682_v60 = vpop.eup %1681 }
 0x517   :  { %1685 = vrcp.f32 %v881_v43  ;;  %v1684_v61 = vpop.eup %1683  ;;  %v894_v35 = vadd.f32 1.0, %v1682_v60 }
 0x518   :  { %1687 = vrcp.f32 %v887_v59 }
 0x519   :  { %1689 = vrcp.f32 %v894_v35 }
 0x521   :  { %v1686_v62 = vpop.eup %1685 }
 0x522   :  { %v1688_v33 = vpop.eup %1687  ;;  %v898_v34 = vmul.f32 %v1686_v62, %v1684_v61 }
 0x523   :  { %v897_v38 = vmul.f32 %v1688_v33, %v2172_v42  ;;  %v1690_v37 = vpop.eup %1689  ;;  %v2230_v42 = vld [vmem:[%s2446_s1 + $0x8] ss:$16 sps:$4 sm:$0xff]  }
 0x525   :  { %v2218_v36 = vadd.f32 %v898_v34, %v897_v38  ;;  %v1756_v38 = vld [vmem:[%s2446_s1 + $0x6c] ss:$16 sps:$4 sm:$0xff]  }
 0x527   :  { %1691 = vtanh.f32 %v2218_v36 }
 0x531   :  { %v1692_v52 = vpop.eup %1691 }
 0x532   :  { %v901_v39 = vmul.f32 %v1692_v52, %v1690_v37  ;;  %v1759_v37 = vld [vmem:[%s2446_s1 + $0x80] ss:$16 sps:$4 sm:$0xff]   ;;  %v1760_v52 = vld [vmem:[%s2446_s1 + $0x88] ss:$16 sps:$4 sm:$0xff]  }
 0x534   :  { %v902_v41 = vpack.c.bf16 %v901_v39, %v901_v39  ;;  %v1761_v39 = vld [vmem:[%s2446_s1 + $0xa4] ss:$16 sps:$4 sm:$0xff]  }
 0x536   :  { %v904_v44 = vrot.slane %v902_v41, 4  ;;  %v908_v45 = vrot.slane %v902_v41, 5  ;;  %970 = vmatmul.mubr.bf16.vlgmr.msra.gmra.mrb[20].mxu0 %v902_v41  ;;  %1011 = vmatmul.mubr.bf16.vlgmr.msra.gmra.mrb[20].mxu1 %v902_v41  ;;  %v1762_v41 = vld [vmem:[%s2446_s1 + $0xac] ss:$16 sps:$4 sm:$0xff]  }
 0x537   :  { %1079 = vmatpush1.bf16.msra.mxu0 %v2224_v46  ;;  %1120 = vmatpush1.bf16.msra.mxu1 %v2230_v42 }
 0x538   :  { %907 = vst.msk [vmem:[#allocation2] sm:$0x10] %vm906_vm8, %v904_v44  ;;  %1080 = vmatprep.subr.bf16.mxu0 %v2236_v47  ;;  %1121 = vmatprep.subr.bf16.mxu1 %v2242_v48  ;;  %v1763_v44 = vld [vmem:[%s2446_s1 + $0xa0] ss:$16 sps:$4 sm:$0xff]  }
 0x539   :  { %911 = vst.msk [vmem:[#allocation2] sm:$0x8] %vm910_vm9, %v908_v45  ;;  %1110 = vmatprep.mubr.bf16.mxu0 %v1773_v1  ;;  %1151 = vmatprep.mubr.bf16.mxu1 %v1773_v1  ;;  %v1764_v45 = vld [vmem:[%s2446_s1 + $0xa8] ss:$16 sps:$4 sm:$0xff]  }
 0x53b   :  { %1081 = vmatpush1.bf16.msra.mxu0 %v2250_v49  ;;  %1122 = vmatpush1.bf16.msra.mxu1 %v2256_v3 }
 0x53c   :  { %1082 = vmatprep.subr.bf16.mxu0 %v2262_v4  ;;  %1123 = vmatprep.subr.bf16.mxu1 %v2268_v5 }
 0x53f   :  { %1083 = vmatpush1.bf16.msra.mxu0 %v2274_v7  ;;  %1124 = vmatpush1.bf16.msra.mxu1 %v2280_v8 }
 0x540   :  { %1084 = vmatprep.subr.bf16.mxu0 %v2286_v9  ;;  %1125 = vmatprep.subr.bf16.mxu1 %v1894_v16  ;;  %v1754_v16 = vld [vmem:[%s2446_s1 + $0x4] ss:$16 sps:$4 sm:$0xff]  }
 0x543   :  { %1085 = vmatpush1.bf16.msra.mxu0 %v2293_v10  ;;  %1126 = vmatpush1.bf16.msra.mxu1 %v1912_v19 }
 0x544   :  { %1086 = vmatprep.subr.bf16.mxu0 %v2300_v11  ;;  %1127 = vmatprep.subr.bf16.mxu1 %v1918_v20 }
 0x547   :  { %1087 = vmatpush1.bf16.msra.mxu0 %v1900_v17  ;;  %1128 = vmatpush1.bf16.msra.mxu1 %v1936_v23  ;;  %v1755_v17 = vld [vmem:[%s2446_s1 + $0xc] ss:$16 sps:$4 sm:$0xff]  }
 0x548   :  { %1088 = vmatprep.subr.bf16.mxu0 %v1906_v18  ;;  %1129 = vmatprep.subr.bf16.mxu1 %v1942_v24  ;;  %v914_v18 = vunpack.c.h.bf16 %v2212_v2 }
 0x54a   :  { %v923_v19 = vrot.slane %v914_v18, %v2040_v40  ;;  %v916_v20 = vcombine.high %v914_v18, %v914_v18 }
 0x54b   :  { %1089 = vmatpush1.bf16.msra.mxu0 %v1924_v21  ;;  %1130 = vmatpush1.bf16.msra.mxu1 %v1960_v27 }
 0x54c   :  { %1090 = vmatprep.subr.bf16.mxu0 %v1929_v22  ;;  %1131 = vmatprep.subr.bf16.mxu1 %v1966_v28  ;;  %v931_v21 = vcombine.high %v923_v19, %v923_v19  ;;  %v930_v23 = vrot.slane %v916_v20, %v2040_v40 }
 0x54e   :  { %v932_v13 = vcombine.high %v930_v23, %v930_v23 }
 0x54f   :  { %1091 = vmatpush1.bf16.msra.mxu0 %v1948_v25  ;;  %1132 = vmatpush1.bf16.msra.mxu1 %v1979_v30 }
 0x550   :  { %1092 = vmatprep.subr.bf16.mxu0 %v1954_v26  ;;  %1133 = vmatprep.subr.bf16.mxu1 %v1985_v31 }
 0x553   :  { %1093 = vmatpush1.bf16.msra.mxu0 %v1972_v29  ;;  %1134 = vmatpush1.bf16.msra.mxu1 %v1992_v32 }
 0x554   :  { %1219 = vmatprep.subr.bf16.mxu0 %v1754_v16  ;;  %1260 = vmatprep.subr.bf16.mxu1 %v1755_v17 }
 0x609   :  { %v971_v22 = vpop.f32.mrb[20].mxu0  ;;  %v1012_v24 = vpop.f32.mrb[20].mxu1 }
 0x60a   :  { %v972_v25 = vadd.f32 %v971_v22, %v923_v19  ;;  %v973_v26 = vpop.f32.mrb[21].mxu0  ;;  %v1014_v27 = vpop.f32.mrb[21].mxu1  ;;  %v1013_v14 = vadd.f32 %v1012_v24, %v930_v23 }
 0x60b   :  { %v974_v28 = vadd.f32 %v973_v26, %v931_v21  ;;  %v975_v29 = vpop.f32.mrb[22].mxu0  ;;  %v1016_v30 = vpop.f32.mrb[22].mxu1  ;;  %v1015_v2 = vadd.f32 %v1014_v27, %v932_v13 }
 0x60c   :  { %v1504_v31 = vmul.f32 -1.442695, %v972_v25  ;;  %v976_v32 = vpop.f32.mrb[23].mxu0  ;;  %v1017_v12 = vpop.f32.mrb[23].mxu1 }
 0x60d   :  { %v1505_v0 = vmul.f32 -1.442695, %v974_v28  ;;  %v1506_v6 = vmul.f32 -1.442695, %v1015_v2 }
 0x60e   :  { %1693 = vpow2.f32 %v1504_v31 }
 0x60f   :  { %1695 = vpow2.f32 %v1505_v0 }
 0x610   :  { %1697 = vpow2.f32 %v1506_v6 }
 0x611   :  { %1699 = vtanh.f32 %v1013_v14 }
 0x618   :  { %v1694_v15 = vpop.eup %1693 }
 0x619   :  { %v1696_v63 = vpop.eup %1695  ;;  %v1022_v50 = vadd.f32 1.0, %v1694_v15 }
 0x61a   :  { %v1028_v51 = vadd.f32 1.0, %v1696_v63  ;;  %v1698_v53 = vpop.eup %1697 }
 0x61b   :  { %1701 = vrcp.f32 %v1022_v50  ;;  %v1700_v54 = vpop.eup %1699  ;;  %v1035_v58 = vadd.f32 1.0, %v1698_v53 }
 0x61c   :  { %1703 = vrcp.f32 %v1028_v51 }
 0x61d   :  { %1705 = vrcp.f32 %v1035_v58 }
 0x625   :  { %v1702_v55 = vpop.eup %1701 }
 0x626   :  { %v1704_v56 = vpop.eup %1703  ;;  %v1039_v57 = vmul.f32 %v1702_v55, %v1700_v54 }
 0x627   :  { %v1038_v43 = vmul.f32 %v1704_v56, %v2218_v36  ;;  %v1706_v60 = vpop.eup %1705  ;;  %v1758_v36 = vld [vmem:[%s2446_s1 + $0x8c] ss:$16 sps:$4 sm:$0xff]  }
 0x629   :  { %v2328_v59 = vadd.f32 %v1039_v57, %v1038_v43 }
 0x62b   :  { %1707 = vtanh.f32 %v2328_v59 }
 0x635   :  { %v1708_v61 = vpop.eup %1707 }
 0x636   :  { %v1042_v62 = vmul.f32 %v1708_v61, %v1706_v60  ;;  %v1775_v61 = vmov 0.0  }
 0x638   :  { %v1043_v33 = vpack.c.bf16 %v1042_v62, %v1042_v62  ;;  %v1606_v62 = vld [vmem:[%s2448_s2 + $0x8] sm:$0xff]  }
 0x63a   :  { %v1045_v34 = vrot.slane %v1043_v33, 3  ;;  %v1049_v35 = vrot.slane %v1043_v33, 6  ;;  %1111 = vmatmul.mubr.bf16.vlgmr.msra.gmra.mrb[24].mxu0 %v1043_v33  ;;  %1152 = vmatmul.mubr.bf16.vlgmr.msra.gmra.mrb[24].mxu1 %v1043_v33  ;;  %v1607_v33 = vld [vmem:[%s2448_s2 + $0x10] sm:$0xff]  }
 0x63b   :  { %1220 = vmatpush1.bf16.msra.mxu0 %v2224_v46  ;;  %1261 = vmatpush1.bf16.msra.mxu1 %v2230_v42  ;;  %v1765_v46 = vld [vmem:[%s2446_s1 + $0xc4] ss:$16 sps:$4 sm:$0xff]   ;;  %v1766_v42 = vld [vmem:[%s2446_s1 + $0xcc] ss:$16 sps:$4 sm:$0xff]  }
 0x63c   :  { %1048 = vst.msk [vmem:[#allocation2] sm:$0x20] %vm1047_vm10, %v1045_v34  ;;  %1221 = vmatprep.subr.bf16.mxu0 %v2236_v47  ;;  %1262 = vmatprep.subr.bf16.mxu1 %v2242_v48  ;;  %v1767_v47 = vld [vmem:[%s2446_s1 + $0xc0] ss:$16 sps:$4 sm:$0xff]   ;;  %v1768_v48 = vld [vmem:[%s2446_s1 + $0xc8] ss:$16 sps:$4 sm:$0xff]  }
 0x63d   :  { %1052 = vst.msk [vmem:[#allocation2] sm:$0x4] %vm1051_vm11, %v1049_v35  ;;  %1251 = vmatprep.mubr.bf16.mxu0 %v1773_v1  ;;  %1292 = vmatprep.mubr.bf16.mxu1 %v1773_v1  ;;  %v1757_v1 = vld [vmem:[%s2446_s1 + $0x68] ss:$16 sps:$4 sm:$0xff]   ;;  %v1609_v35 = vld [vmem:[%s2448_s2 + $0x20] sm:$0xff]  }
 0x63e   :  { %v1608_v34 = vld [vmem:[%s2448_s2 + $0x18] sm:$0xff]  }
 0x63f   :  { %1222 = vmatpush1.bf16.msra.mxu0 %v2250_v49  ;;  %1263 = vmatpush1.bf16.msra.mxu1 %v2256_v3  ;;  %v1769_v49 = vld [vmem:[%s2446_s1 + $0xe4] ss:$16 sps:$4 sm:$0xff]   ;;  %v1770_v3 = vld [vmem:[%s2446_s1 + $0xec] ss:$16 sps:$4 sm:$0xff]  }
 0x640   :  { %1223 = vmatprep.subr.bf16.mxu0 %v2262_v4  ;;  %1264 = vmatprep.subr.bf16.mxu1 %v2268_v5  ;;  %v1771_v4 = vld [vmem:[%s2446_s1 + $0xe0] ss:$16 sps:$4 sm:$0xff]   ;;  %v1772_v5 = vld [vmem:[%s2446_s1 + $0xe8] ss:$16 sps:$4 sm:$0xff]  }
 0x643   :  { %1224 = vmatpush1.bf16.msra.mxu0 %v2274_v7  ;;  %1265 = vmatpush1.bf16.msra.mxu1 %v2280_v8  ;;  %v2400_v7 = vld [vmem:[%s2447_s0 + $0x18] sm:$0xff]  }
 0x644   :  { %1225 = vmatprep.subr.bf16.mxu0 %v2286_v9  ;;  %1266 = vmatprep.subr.bf16.mxu1 %v1756_v38  ;;  %v1055_v8 = vunpack.c.l.bf16 %v2400_v7  ;;  %v1610_v38 = vld [vmem:[%s2448_s2 + $0x28] sm:$0xff]  }
 0x646   :  { %v1064_v9 = vrot.slane %v1055_v8, %v2040_v40 }
 0x647   :  { %1226 = vmatpush1.bf16.msra.mxu0 %v2293_v10  ;;  %1267 = vmatpush1.bf16.msra.mxu1 %v1757_v1  ;;  %v1057_v10 = vcombine.high %v1055_v8, %v1055_v8  ;;  %v1611_v1 = vld [vmem:[%s2448_s2 + $0x30] sm:$0xff]  }
 0x648   :  { %1227 = vmatprep.subr.bf16.mxu0 %v2300_v11  ;;  %1268 = vmatprep.subr.bf16.mxu1 %v1758_v36  ;;  %v1072_v11 = vcombine.high %v1064_v9, %v1064_v9  ;;  %v1612_v36 = vld [vmem:[%s2448_s2 + $0x38] sm:$0xff]  }
 0x649   :  { %v1071_v17 = vrot.slane %v1057_v10, %v2040_v40 }
 0x64b   :  { %1228 = vmatpush1.bf16.msra.mxu0 %v1759_v37  ;;  %1269 = vmatpush1.bf16.msra.mxu1 %v1760_v52  ;;  %v1073_v29 = vcombine.high %v1071_v17, %v1071_v17  ;;  %v1196_v37 = vunpack.c.h.bf16 %v2400_v7 }
 0x64c   :  { %1229 = vmatprep.subr.bf16.mxu0 %v1761_v39  ;;  %1270 = vmatprep.subr.bf16.mxu1 %v1762_v41 }
 0x64d   :  { %v1205_v52 = vrot.slane %v1196_v37, %v2040_v40  ;;  %v1198_v39 = vcombine.high %v1196_v37, %v1196_v37 }
 0x64f   :  { %1230 = vmatpush1.bf16.msra.mxu0 %v1763_v44  ;;  %1271 = vmatpush1.bf16.msra.mxu1 %v1764_v45  ;;  %v1213_v41 = vcombine.high %v1205_v52, %v1205_v52  ;;  %v1212_v45 = vrot.slane %v1198_v39, %v2040_v40 }
 0x650   :  { %1231 = vmatprep.subr.bf16.mxu0 %v1765_v46  ;;  %1272 = vmatprep.subr.bf16.mxu1 %v1766_v42 }
 0x653   :  { %1232 = vmatpush1.bf16.msra.mxu0 %v1767_v47  ;;  %1273 = vmatpush1.bf16.msra.mxu1 %v1768_v48 }
 0x654   :  { %1233 = vmatprep.subr.bf16.mxu0 %v1769_v49  ;;  %1274 = vmatprep.subr.bf16.mxu1 %v1770_v3 }
 0x657   :  { %1234 = vmatpush1.bf16.msra.mxu0 %v1771_v4  ;;  %1275 = vmatpush1.bf16.msra.mxu1 %v1772_v5 }
 0x658   :  { %1533 = vmatprep.subr.bf16.mxu0 %v1775_v61 }
 0x70d   :  { %v1112_v16 = vpop.f32.mrb[24].mxu0  ;;  %v1153_v18 = vpop.f32.mrb[24].mxu1 }
 0x70e   :  { %v1113_v19 = vadd.f32 %v1112_v16, %v1064_v9  ;;  %v1114_v20 = vpop.f32.mrb[25].mxu0  ;;  %v1155_v21 = vpop.f32.mrb[25].mxu1  ;;  %v1154_v32 = vadd.f32 %v1153_v18, %v1071_v17 }
 0x70f   :  { %v1115_v22 = vadd.f32 %v1114_v20, %v1072_v11  ;;  %v1116_v23 = vpop.f32.mrb[26].mxu0  ;;  %v1157_v24 = vpop.f32.mrb[26].mxu1  ;;  %v1156_v30 = vadd.f32 %v1155_v21, %v1073_v29  ;;  %v1214_v11 = vcombine.high %v1212_v45, %v1212_v45 }
 0x710   :  { %v1508_v25 = vmul.f32 -1.442695, %v1113_v19  ;;  %v1117_v26 = vpop.f32.mrb[27].mxu0  ;;  %v1158_v27 = vpop.f32.mrb[27].mxu1 }
 0x711   :  { %v1509_v28 = vmul.f32 -1.442695, %v1115_v22  ;;  %v1510_v31 = vmul.f32 -1.442695, %v1156_v30 }
 0x712   :  { %1709 = vpow2.f32 %v1508_v25 }
 0x713   :  { %1711 = vpow2.f32 %v1509_v28 }
 0x714   :  { %1713 = vpow2.f32 %v1510_v31 }
 0x715   :  { %1715 = vtanh.f32 %v1154_v32 }
 0x71c   :  { %v1710_v12 = vpop.eup %1709 }
 0x71d   :  { %v1712_v0 = vpop.eup %1711  ;;  %v1163_v13 = vadd.f32 1.0, %v1710_v12 }
 0x71e   :  { %v1169_v2 = vadd.f32 1.0, %v1712_v0  ;;  %v1714_v6 = vpop.eup %1713 }
 0x71f   :  { %1717 = vrcp.f32 %v1163_v13  ;;  %v1716_v14 = vpop.eup %1715  ;;  %v1176_v51 = vadd.f32 1.0, %v1714_v6  ;;  %v1515_v13 = vld [vmem:[%s2449_s3] ss:$0 sm:$0xff] }
 0x720   :  { %1719 = vrcp.f32 %v1169_v2 }
 0x721   :  { %1721 = vrcp.f32 %v1176_v51 }
 0x729   :  { %v1718_v15 = vpop.eup %1717 }
 0x72a   :  { %v1720_v63 = vpop.eup %1719  ;;  %v1180_v50 = vmul.f32 %v1718_v15, %v1716_v14 }
 0x72b   :  { %v1179_v53 = vmul.f32 %v1720_v63, %v2328_v59  ;;  %v1722_v55 = vpop.eup %1721  ;;  %v1605_v59 = vld [vmem:[%s2448_s2] sm:$0xff]  }
 0x72d   :  { %v2406_v54 = vadd.f32 %v1180_v50, %v1179_v53 }
 0x72f   :  { %1723 = vtanh.f32 %v2406_v54 }
 0x739   :  { %v1724_v56 = vpop.eup %1723 }
 0x73a   :  { %v1183_v57 = vmul.f32 %v1724_v56, %v1722_v55 }
 0x73c   :  { %v1184_v58 = vpack.c.bf16 %v1183_v57, %v1183_v57 }
 0x73e   :  { %v1186_v43 = vrot.slane %v1184_v58, 2  ;;  %v1190_v60 = vrot.slane %v1184_v58, 7  ;;  %1252 = vmatmul.mubr.bf16.vlgmr.msra.gmra.mrb[28].mxu0 %v1184_v58  ;;  %1293 = vmatmul.mubr.bf16.vlgmr.msra.gmra.mrb[28].mxu1 %v1184_v58 }
 0x73f   :  { %1534 = vmatpush3.bf16.msra.mxu0 %v1605_v59  ;;  %1549 = vmatprep.mubr.msk.bf16.mxu0 %vm1776_vm14, %v1775_v61 }
 0x740   :  { %1189 = vst.msk [vmem:[#allocation2] sm:$0x40] %vm1188_vm12, %v1186_v43  ;;  %1535 = vmatprep.subr.bf16.mxu0 %v1775_v61 }
 0x741   :  { %1193 = vst.msk [vmem:[#allocation2] sm:$0x2] %vm1192_vm13, %v1190_v60 }
 0x743   :  { %1536 = vmatpush3.bf16.msra.mxu0 %v1606_v62 }
 0x744   :  { %1537 = vmatprep.subr.bf16.mxu0 %v1775_v61 }
 0x747   :  { %1538 = vmatpush3.bf16.msra.mxu0 %v1607_v33 }
 0x748   :  { %1539 = vmatprep.subr.bf16.mxu0 %v1775_v61 }
 0x74b   :  { %1540 = vmatpush3.bf16.msra.mxu0 %v1608_v34 }
 0x74c   :  { %1541 = vmatprep.subr.bf16.mxu0 %v1775_v61 }
 0x74f   :  { %1542 = vmatpush3.bf16.msra.mxu0 %v1609_v35 }
 0x750   :  { %1543 = vmatprep.subr.bf16.mxu0 %v1775_v61 }
 0x753   :  { %1544 = vmatpush3.bf16.msra.mxu0 %v1610_v38 }
 0x754   :  { %1545 = vmatprep.subr.bf16.mxu0 %v1775_v61 }
 0x757   :  { %1546 = vmatpush3.bf16.msra.mxu0 %v1611_v1 }
 0x758   :  { %1547 = vmatprep.subr.bf16.mxu0 %v1775_v61 }
 0x75b   :  { %1548 = vmatpush3.bf16.msra.mxu0 %v1612_v36 }
 0x811   :  { %v1253_v44 = vpop.f32.mrb[28].mxu0  ;;  %v1294_v46 = vpop.f32.mrb[28].mxu1 }
 0x812   :  { %v1254_v42 = vadd.f32 %v1253_v44, %v1205_v52  ;;  %v1255_v47 = vpop.f32.mrb[29].mxu0  ;;  %v1296_v48 = vpop.f32.mrb[29].mxu1  ;;  %v1295_v17 = vadd.f32 %v1294_v46, %v1212_v45 }
 0x813   :  { %v1256_v49 = vadd.f32 %v1255_v47, %v1213_v41  ;;  %v1257_v3 = vpop.f32.mrb[30].mxu0  ;;  %v1298_v4 = vpop.f32.mrb[30].mxu1  ;;  %v1297_v7 = vadd.f32 %v1296_v48, %v1214_v11 }
 0x814   :  { %v1512_v5 = vmul.f32 -1.442695, %v1254_v42  ;;  %v1258_v8 = vpop.f32.mrb[31].mxu0  ;;  %v1299_v9 = vpop.f32.mrb[31].mxu1 }
 0x815   :  { %v1513_v10 = vmul.f32 -1.442695, %v1256_v49  ;;  %v1514_v16 = vmul.f32 -1.442695, %v1297_v7 }
 0x816   :  { %1725 = vpow2.f32 %v1512_v5 }
 0x817   :  { %1727 = vpow2.f32 %v1513_v10 }
 0x818   :  { %1729 = vpow2.f32 %v1514_v16 }
 0x819   :  { %1731 = vtanh.f32 %v1295_v17 }
 0x820   :  { %v1726_v18 = vpop.eup %1725 }
 0x821   :  { %v1728_v19 = vpop.eup %1727  ;;  %v1304_v40 = vadd.f32 1.0, %v1726_v18 }
 0x822   :  { %v1310_v20 = vadd.f32 1.0, %v1728_v19  ;;  %v1730_v21 = vpop.eup %1729 }
 0x823   :  { %1733 = vrcp.f32 %v1304_v40  ;;  %v1732_v22 = vpop.eup %1731  ;;  %v1317_v26 = vadd.f32 1.0, %v1730_v21 }
 0x824   :  { %1735 = vrcp.f32 %v1310_v20 }
 0x825   :  { %1737 = vrcp.f32 %v1317_v26 }
 0x82d   :  { %v1734_v23 = vpop.eup %1733 }
 0x82e   :  { %v1736_v24 = vpop.eup %1735  ;;  %v1321_v25 = vmul.f32 %v1734_v23, %v1732_v22 }
 0x82f   :  { %v1320_v27 = vmul.f32 %v1736_v24, %v2406_v54  ;;  %v1738_v29 = vpop.eup %1737 }
 0x831   :  { %v1322_v28 = vadd.f32 %v1321_v25, %v1320_v27 }
 0x833   :  { %1739 = vtanh.f32 %v1322_v28 }
 0x83d   :  { %v1740_v30 = vpop.eup %1739 }
 0x83e   :  { %v1324_v31 = vmul.f32 %v1740_v30, %v1738_v29 }
 0x840   :  { %v1325_v32 = vpack.c.bf16 %v1324_v31, %v1324_v31 }
 0x842   :  { %v1327_v12 = vrot.slane %v1325_v32, 1  ;;  %1332 = vst.msk [vmem:[#allocation2] sm:$0x1] %vm1331_vm15, %v1325_v32 }
 0x844   :  { %1330 = vst.msk [vmem:[#allocation2] sm:$0x80] %vm1329_vm0, %v1327_v12 }
 0x84b   :  { %v1333_v0 = vld [vmem:[#allocation2] sm:$0xff] }
 0x84c   :  { %1550 = vmatmul.mubr.bf16.vlgmr.msra.gmra.mrb[32].mxu0 %v1333_v0 }
 0x91f   :  { %v1439_v2 = vpop.f32.mrb[32].mxu0 }
 0x920   :  { %v1440_v6 = vadd.f32 %v1515_v13, %v1439_v2  ;;  %v1551_v14 = vpop.f32.mrb[33].mxu0 }
 0x921   :  { %v1442_v15 = vpop.f32.mrb[34].mxu0 }
 0x922   :  { %1446 = vst [vmem:[%s2450_s4] sm:$0xff] %v1440_v6  ;;  %v1443_v63 = vadd.f32 %v1515_v13, %v1442_v15  ;;  %v1552_v50 = vpop.f32.mrb[35].mxu0 }
 0x924   :  { %1447 = vst [vmem:[%s2450_s4 + $0x8] sm:$0xff] %v1443_v63 }

</bundles_post_ra>
